<compile_context>
chip_gen: v5e
topology: v5e:2x2
jax: 0.10.0
libtpu: 0.0.40
codegen_flags: <defaults>
</compile_context>

<pallas_src>
import functools

import jax
import jax.numpy as jnp
from jax.experimental import pallas as pl
from jax.experimental.pallas import tpu as pltpu

LANE = 128          # TPU lane width; each GRU gate / head half gets its own block
G3 = 3 * LANE       # fused gate width  [r | z | n]
G2 = 2 * LANE       # fused head width  [mean | vars]


# -----------------------------------------------------------------------------
# Fused forward kernel (no grid: footprint is KiB-scale; the GRU recurrence is
# inherently serial so a single TensorCore does the work anyway).
# TODO(synk): on v7x, shard independent sequences across the 2 TensorCores at
# the program level (vmap / outer grid) rather than inside this B=2 kernel.
# -----------------------------------------------------------------------------
def _make_danse_kernel(n_layers, B, T, H, Hd):
    steps = T - 1        # valid ONLY because outputs use r_out[:, :-1] (shift by 1)
    LROWS = 2 * H + 8    # per-layer rows in gru_pack: W_ih (H) + W_hh (H) + biases (pad to 8)

    def kernel(xs_ref, h0_ref, gru_ref, head_ref, out_ref,
               proj_ref, seq_ref, hin_ref):
        f32 = jnp.float32

        # ---- head-input rows 0..2B-1: the two independent h0 draws -----------
        hin_ref[pl.ds(0, 2 * B), :] = h0_ref[...]

        # layer>0 projections read the whole seq buffer; zero it once so the
        # (never-consumed) rows past step T-2 can't be uninitialized garbage.
        if n_layers > 1:
            seq_ref[...] = jnp.zeros_like(seq_ref)

        # ---- GRU stack (PyTorch gate order [r, z, n], h0 = zeros) -------------
        for l in range(n_layers):
            base = l * LROWS
            w_ih = gru_ref[pl.ds(base, H), :]            # (H, 3*128) lane-padded
            w_hh = gru_ref[pl.ds(base + H, H), :]        # (H, 3*128) lane-padded
            b2 = gru_ref[pl.ds(base + 2 * H, 2), :]      # (2, 3*128)
            b_i = b2[0:1, :]                             # [b_ir+b_hr | b_iz+b_hz | b_in]
            # hoisted broadcast (JAX does not CSE broadcast_in_dim in the unroll)
            bhn = jnp.broadcast_to(b2[1:2, 2 * LANE:2 * LANE + H], (B, H))

            # Hoisted input projection: ONE fused matmul over all timesteps.
            xall = xs_ref[...] if l == 0 else seq_ref[...]            # (T*B, H)
            proj_ref[...] = jnp.dot(xall, w_ih, preferred_element_type=f32) + b_i

            # TODO(synk): optionally hold w_hh in MXU staging registers across
            # the time loop via pltpu.matmul_push_rhs/matmul_acc_lhs/matmul_pop.
            # TODO(synk): optionally wavefront-schedule layer l step t with
            # layer l-1 step t+1 to fill MXU/EUP latency bubbles.
            last = l == n_layers - 1
            h = jnp.zeros((B, H), f32)
            for t in range(steps):
                rows = pl.ds(t * B, B)
                g = jnp.dot(h, w_hh, preferred_element_type=f32)      # (B, 3*128)
                p = proj_ref[rows, :]                                 # (B, 3*128)
                r = jax.nn.sigmoid(p[:, 0:H] + g[:, 0:H])
                z = jax.nn.sigmoid(p[:, LANE:LANE + H] + g[:, LANE:LANE + H])
                n = jnp.tanh(p[:, 2 * LANE:2 * LANE + H]
                             + r * (g[:, 2 * LANE:2 * LANE + H] + bhn))
                h = (1.0 - z) * n + z * h
                if last:
                    hin_ref[pl.ds((2 + t) * B, B), :] = h    # feeds the head
                else:
                    seq_ref[rows, :] = h                     # feeds next layer

        # ---- merged dense head on [h0_mu; h0_var; h_0 .. h_{T-2}] -------------
        w_fc = head_ref[pl.ds(0, H), pl.ds(0, Hd)]           # (H, Hd)
        w_mv = head_ref[pl.ds(H, Hd), :]                     # (Hd, 2*128): [mean|vars]
        b_fc = head_ref[pl.ds(H + Hd, 1), pl.ds(0, Hd)]      # (1, Hd)
        b_mv = head_ref[pl.ds(H + Hd + 1, 1), :]             # (1, 2*128)

        hin = hin_ref[...]                                   # ((T+1)*B, H)
        y = jnp.maximum(jnp.dot(hin, w_fc, preferred_element_type=f32) + b_fc, 0.0)
        mv = jnp.dot(y, w_mv, preferred_element_type=f32) + b_mv   # ((T+1)*B, 256)

        out_ref[:, 0:LANE] = mv[:, 0:LANE]                   # means (lanes [0:O] valid)
        v = mv[:, LANE:2 * LANE]
        # numerically-stable softplus (matches F.softplus to <1e-8 in fp32)
        out_ref[:, LANE:2 * LANE] = jnp.maximum(v, 0.0) + jnp.log1p(jnp.exp(-jnp.abs(v)))

    return kernel


# -----------------------------------------------------------------------------
# Wrapper: cheap XLA pre/post-processing around one pallas_call.
# -----------------------------------------------------------------------------
def danse_forward(gru_pack, head_pack, dims, x, h0_mu_last, h0_var_last):
    n_layers, H, Hd, O = dims
    B, T, D = x.shape
    assert D <= H, "packed layout assumes input_size <= n_hidden"

    # x repack + feature zero-pad done here (fused by XLA); kernel sees one
    # sublane/lane-friendly (T*B, H) buffer in (t, b) row order.
    x_tb = jnp.transpose(x, (1, 0, 2)).reshape(T * B, D).astype(jnp.float32)
    xs = jnp.zeros((T * B, H), jnp.float32).at[:, :D].set(x_tb)
    h0 = jnp.concatenate([h0_mu_last, h0_var_last], axis=0).astype(jnp.float32)

    vmem = pl.BlockSpec(memory_space=pltpu.MemorySpace.VMEM)
    kernel = _make_danse_kernel(n_layers, B, T, H, Hd)

    head = pl.pallas_call(
        kernel,
        out_shape=jax.ShapeDtypeStruct(((T + 1) * B, G2), jnp.float32),
        in_specs=[vmem, vmem, vmem, vmem],
        out_specs=vmem,
        scratch_shapes=[
            pltpu.VMEM((T * B, G3), jnp.float32),        # fused hoisted projections
            pltpu.VMEM((T * B, H), jnp.float32),         # layer output sequence
            pltpu.VMEM(((T + 1) * B, H), jnp.float32),   # merged head input
        ],
    )(xs, h0, gru_pack, head_pack)

    # Gather/shift/transpose in XLA (tiny arrays): time 0 <- the two h0 heads,
    # time t>=1 <- last-layer hidden state at step t-1.
    mu_all = head[:, 0:O]                                 # ((T+1)*B, O)
    var_all = head[:, LANE:LANE + O]
    mu_seq = mu_all[2 * B:].reshape(T - 1, B, O).transpose(1, 0, 2)
    var_seq = var_all[2 * B:].reshape(T - 1, B, O).transpose(1, 0, 2)
    mu = jnp.concatenate([mu_all[0:B][:, None, :], mu_seq], axis=1)
    vars_ = jnp.concatenate([var_all[B:2 * B][:, None, :], var_seq], axis=1)
    return mu, vars_


# -----------------------------------------------------------------------------
# Parameter init in PyTorch layout, plus one-time packing into the two fused,
# lane-padded buffers the kernel consumes (all row offsets 8-aligned).
# -----------------------------------------------------------------------------
def init_params(key, input_size, n_hidden, n_layers, n_hidden_dense, output_size):
    keys = iter(jax.random.split(key, 4 * n_layers + 6))

    def unif(k, shape, fan):
        bound = 1.0 / (fan ** 0.5)
        return jax.random.uniform(k, shape, jnp.float32, -bound, bound)

    gru = []
    for layer in range(n_layers):
        in_dim = input_size if layer == 0 else n_hidden
        gru.append(dict(
            w_ih=unif(next(keys), (3 * n_hidden, in_dim), n_hidden),
            w_hh=unif(next(keys), (3 * n_hidden, n_hidden), n_hidden),
            b_ih=unif(next(keys), (3 * n_hidden,), n_hidden),
            b_hh=unif(next(keys), (3 * n_hidden,), n_hidden),
        ))
    return dict(
        gru=gru,
        w_fc=unif(next(keys), (n_hidden_dense, n_hidden), n_hidden),
        b_fc=unif(next(keys), (n_hidden_dense,), n_hidden),
        w_mean=unif(next(keys), (output_size, n_hidden_dense), n_hidden_dense),
        b_mean=unif(next(keys), (output_size,), n_hidden_dense),
        w_vars=unif(next(keys), (output_size, n_hidden_dense), n_hidden_dense),
        b_vars=unif(next(keys), (output_size,), n_hidden_dense),
    )


def pack_params(params, input_size, n_hidden, n_layers, n_hidden_dense, output_size):
    H, Hd, O = n_hidden, n_hidden_dense, output_size
    LROWS = 2 * H + 8

    gru_pack = jnp.zeros((n_layers * LROWS, G3), jnp.float32)
    for l, lyr in enumerate(params["gru"]):
        base = l * LROWS
        in_dim = input_size if l == 0 else H
        w_ih = lyr["w_ih"].reshape(3, H, in_dim)
        w_hh = lyr["w_hh"].reshape(3, H, H)
        b_ih = lyr["b_ih"].reshape(3, H)
        b_hh = lyr["b_hh"].reshape(3, H)
        for g in range(3):  # gate g -> lanes [g*128 : g*128+H]
            gru_pack = gru_pack.at[base:base + in_dim,
                                   g * LANE:g * LANE + H].set(w_ih[g].T)
            gru_pack = gru_pack.at[base + H:base + 2 * H,
                                   g * LANE:g * LANE + H].set(w_hh[g].T)
        # bias row 0: [b_ir+b_hr | b_iz+b_hz | b_in]; row 1: b_hn in the n block
        gru_pack = gru_pack.at[base + 2 * H, 0:H].set(b_ih[0] + b_hh[0])
        gru_pack = gru_pack.at[base + 2 * H, LANE:LANE + H].set(b_ih[1] + b_hh[1])
        gru_pack = gru_pack.at[base + 2 * H, 2 * LANE:2 * LANE + H].set(b_ih[2])
        gru_pack = gru_pack.at[base + 2 * H + 1, 2 * LANE:2 * LANE + H].set(b_hh[2])

    head_pack = jnp.zeros((H + Hd + 2, G2), jnp.float32)
    head_pack = head_pack.at[0:H, 0:Hd].set(params["w_fc"].T)
    head_pack = head_pack.at[H:H + Hd, 0:O].set(params["w_mean"].T)
    head_pack = head_pack.at[H:H + Hd, LANE:LANE + O].set(params["w_vars"].T)
    head_pack = head_pack.at[H + Hd, 0:Hd].set(params["b_fc"])
    head_pack = head_pack.at[H + Hd + 1, 0:O].set(params["b_mean"])
    head_pack = head_pack.at[H + Hd + 1, LANE:LANE + O].set(params["b_vars"])
    return gru_pack, head_pack


# -----------------------------------------------------------------------------
# Pure-JAX reference (unfused, PyTorch-layout math) for a correctness check.
# -----------------------------------------------------------------------------
def danse_reference(params, x, h0_mu_last, h0_var_last):
    B, T, _ = x.shape
    seq = x.astype(jnp.float32)
    for lyr in params["gru"]:
        H = lyr["w_hh"].shape[1]
        h = jnp.zeros((B, H), jnp.float32)
        outs = []
        for t in range(T):
            gi = seq[:, t, :] @ lyr["w_ih"].T + lyr["b_ih"]
            gh = h @ lyr["w_hh"].T + lyr["b_hh"]
            i_r, i_z, i_n = jnp.split(gi, 3, axis=1)
            h_r, h_z, h_n = jnp.split(gh, 3, axis=1)
            r = jax.nn.sigmoid(i_r + h_r)
            z = jax.nn.sigmoid(i_z + h_z)
            n = jnp.tanh(i_n + r * h_n)
            h = (1.0 - z) * n + z * h
            outs.append(h)
        seq = jnp.stack(outs, axis=1)

    def head(hvec):
        y = jax.nn.relu(hvec @ params["w_fc"].T + params["b_fc"])
        return (y @ params["w_mean"].T + params["b_mean"],
                jax.nn.softplus(y @ params["w_vars"].T + params["b_vars"]))

    mu2, va2 = head(seq)
    mu1, _ = head(h0_mu_last)
    _, va1 = head(h0_var_last)
    mu = jnp.concatenate([mu1[:, None, :], mu2[:, :-1, :]], axis=1)
    vars_ = jnp.concatenate([va1[:, None, :], va2[:, :-1, :]], axis=1)
    return mu, vars_


if __name__ == "__main__":
    # Small shapes consistent with the module's forward.
    B, T = 2, 8
    input_size, n_hidden, n_layers = 4, 32, 2
    n_hidden_dense, output_size = 32, 4

    root = jax.random.PRNGKey(0)
    k_params, k_x, k_h0a, k_h0b = jax.random.split(root, 4)

    params = init_params(k_params, input_size, n_hidden, n_layers,
                         n_hidden_dense, output_size)
    gru_pack, head_pack = pack_params(params, input_size, n_hidden, n_layers,
                                      n_hidden_dense, output_size)

    x = jax.random.normal(k_x, (B, T, input_size), jnp.float32)
    # init_h0 is called twice in the PyTorch forward (two independent randn
    # draws of shape (n_layers, B, n_hidden)); take the last layer [-1] of each.
    h0_mu = jax.random.normal(k_h0a, (n_layers, B, n_hidden), jnp.float32)[-1]
    h0_var = jax.random.normal(k_h0b, (n_layers, B, n_hidden), jnp.float32)[-1]

    dims = (n_layers, n_hidden, n_hidden_dense, output_size)
    fwd = jax.jit(functools.partial(danse_forward, gru_pack, head_pack, dims))
    mu, vars_ = fwd(x, h0_mu, h0_var)
    jax.block_until_ready((mu, vars_))

    assert mu.shape == (B, T, output_size), mu.shape
    assert vars_.shape == (B, T, output_size), vars_.shape
    assert bool(jnp.all(vars_ > 0.0))              # softplus output must be positive
    assert bool(jnp.all(jnp.isfinite(mu))) and bool(jnp.all(jnp.isfinite(vars_)))

    # Reference check (loose tolerance covers MXU f32 rounding differences
    # between the fused lane-padded matmuls and the unfused XLA reference).
    mu_ref, vars_ref = danse_reference(params, x, h0_mu, h0_var)
    assert bool(jnp.allclose(mu, mu_ref, atol=5e-2, rtol=5e-2)), \
        float(jnp.max(jnp.abs(mu - mu_ref)))
    assert bool(jnp.allclose(vars_, vars_ref, atol=5e-2, rtol=5e-2)), \
        float(jnp.max(jnp.abs(vars_ - vars_ref)))

    print("KERNEL_OK")
</pallas_src>

<mosaic_0001>
module attributes {stable_mosaic.version = 11 : i64} {
  func.func @kernel(%arg0: memref<16x32xf32, #tpu.memory_space<vmem>>, %arg1: memref<4x32xf32, #tpu.memory_space<vmem>>, %arg2: memref<144x384xf32, #tpu.memory_space<vmem>>, %arg3: memref<66x256xf32, #tpu.memory_space<vmem>>, %arg4: memref<18x256xf32, #tpu.memory_space<vmem>>, %arg5: memref<16x384xf32, #tpu.memory_space<vmem>>, %arg6: memref<16x32xf32, #tpu.memory_space<vmem>>, %arg7: memref<18x32xf32, #tpu.memory_space<vmem>>) attributes {dimension_semantics = [], scalar_prefetch = 0 : i64, scratch_operands = 3 : i64, tpu.core_type = #tpu.core_type<tc>} {
    %c0 = arith.constant 0 : index
    %c0_0 = arith.constant 0 : index
    %0 = vector.load %arg1[%c0, %c0_0] : memref<4x32xf32, #tpu.memory_space<vmem>>, vector<4x32xf32>
    %c0_1 = arith.constant 0 : index
    %c0_2 = arith.constant 0 : index
    %1 = vector.load %arg7[%c0_1, %c0_2] : memref<18x32xf32, #tpu.memory_space<vmem>>, vector<4x32xf32>
    tpu.vector_store %arg7[%c0_1, %c0_2], %0 {strides = array<i32>} : memref<18x32xf32, #tpu.memory_space<vmem>>, vector<4x32xf32>,
    %cst = arith.constant 0.000000e+00 : f32
    %2 = vector.broadcast %cst : f32 to vector<16x32xf32>
    %c0_3 = arith.constant 0 : index
    %c0_4 = arith.constant 0 : index
    %3 = vector.load %arg6[%c0_3, %c0_4] : memref<16x32xf32, #tpu.memory_space<vmem>>, vector<16x32xf32>
    tpu.vector_store %arg6[%c0_3, %c0_4], %2 {strides = array<i32>} : memref<16x32xf32, #tpu.memory_space<vmem>>, vector<16x32xf32>,
    %c0_5 = arith.constant 0 : index
    %c0_6 = arith.constant 0 : index
    %4 = vector.load %arg2[%c0_5, %c0_6] : memref<144x384xf32, #tpu.memory_space<vmem>>, vector<32x384xf32>
    %c32 = arith.constant 32 : index
    %c0_7 = arith.constant 0 : index
    %5 = vector.load %arg2[%c32, %c0_7] : memref<144x384xf32, #tpu.memory_space<vmem>>, vector<32x384xf32>
    %c64 = arith.constant 64 : index
    %c0_8 = arith.constant 0 : index
    %6 = vector.load %arg2[%c64, %c0_8] : memref<144x384xf32, #tpu.memory_space<vmem>>, vector<2x384xf32>
    %7 = vector.extract_strided_slice %6 {offsets = [0, 0], sizes = [1, 384], strides = [1, 1]} : vector<2x384xf32> to vector<1x384xf32>
    %8 = vector.extract_strided_slice %6 {offsets = [1, 256], sizes = [1, 32], strides = [1, 1]} : vector<2x384xf32> to vector<1x32xf32>
    %9 = vector.shape_cast %8 : vector<1x32xf32> to vector<1x32xf32>
    %10 = vector.broadcast %9 : vector<1x32xf32> to vector<2x32xf32>
    %c0_9 = arith.constant 0 : index
    %c0_10 = arith.constant 0 : index
    %11 = vector.load %arg0[%c0_9, %c0_10] : memref<16x32xf32, #tpu.memory_space<vmem>>, vector<16x32xf32>
    %cst_11 = arith.constant dense<0.000000e+00> : vector<16x384xf32>
    %12 = tpu.matmul %11, %4, %cst_11 {dimension_numbers = #tpu.dot_dimension_numbers<[1], [0], [0], [1], [0, 0, 1, 1], [], []>} : vector<16x32xf32>, vector<32x384xf32>, vector<16x384xf32> -> vector<16x384xf32>
    %13 = vector.broadcast %7 : vector<1x384xf32> to vector<16x384xf32>
    %14 = arith.addf %12, %13 : vector<16x384xf32>
    %c0_12 = arith.constant 0 : index
    %c0_13 = arith.constant 0 : index
    %15 = vector.load %arg5[%c0_12, %c0_13] : memref<16x384xf32, #tpu.memory_space<vmem>>, vector<16x384xf32>
    tpu.vector_store %arg5[%c0_12, %c0_13], %14 {strides = array<i32>} : memref<16x384xf32, #tpu.memory_space<vmem>>, vector<16x384xf32>,
    %cst_14 = arith.constant 0.000000e+00 : f32
    %16 = vector.broadcast %cst_14 : f32 to vector<2x32xf32>
    %cst_15 = arith.constant dense<0.000000e+00> : vector<2x384xf32>
    %17 = tpu.matmul %16, %5, %cst_15 {dimension_numbers = #tpu.dot_dimension_numbers<[1], [0], [0], [1], [0, 0, 1, 1], [], []>} : vector<2x32xf32>, vector<32x384xf32>, vector<2x384xf32> -> vector<2x384xf32>
    %c0_16 = arith.constant 0 : index
    %c0_17 = arith.constant 0 : index
    %18 = vector.load %arg5[%c0_16, %c0_17] : memref<16x384xf32, #tpu.memory_space<vmem>>, vector<2x384xf32>
    %19 = vector.extract_strided_slice %18 {offsets = [0, 0], sizes = [2, 32], strides = [1, 1]} : vector<2x384xf32> to vector<2x32xf32>
    %20 = vector.extract_strided_slice %17 {offsets = [0, 0], sizes = [2, 32], strides = [1, 1]} : vector<2x384xf32> to vector<2x32xf32>
    %21 = arith.addf %19, %20 : vector<2x32xf32>
    %22 = arith.negf %21 : vector<2x32xf32>
    %23 = math.exp %22 : vector<2x32xf32>
    %cst_18 = arith.constant 1.000000e+00 : f32
    %24 = vector.broadcast %cst_18 : f32 to vector<2x32xf32>
    %25 = arith.addf %24, %23 : vector<2x32xf32>
    %26 = arith.divf %24, %25 : vector<2x32xf32>
    %27 = vector.extract_strided_slice %18 {offsets = [0, 128], sizes = [2, 32], strides = [1, 1]} : vector<2x384xf32> to vector<2x32xf32>
    %28 = vector.extract_strided_slice %17 {offsets = [0, 128], sizes = [2, 32], strides = [1, 1]} : vector<2x384xf32> to vector<2x32xf32>
    %29 = arith.addf %27, %28 : vector<2x32xf32>
    %30 = arith.negf %29 : vector<2x32xf32>
    %31 = math.exp %30 : vector<2x32xf32>
    %cst_19 = arith.constant 1.000000e+00 : f32
    %32 = vector.broadcast %cst_19 : f32 to vector<2x32xf32>
    %33 = arith.addf %32, %31 : vector<2x32xf32>
    %34 = arith.divf %32, %33 : vector<2x32xf32>
    %35 = vector.extract_strided_slice %18 {offsets = [0, 256], sizes = [2, 32], strides = [1, 1]} : vector<2x384xf32> to vector<2x32xf32>
    %36 = vector.extract_strided_slice %17 {offsets = [0, 256], sizes = [2, 32], strides = [1, 1]} : vector<2x384xf32> to vector<2x32xf32>
    %37 = arith.addf %36, %10 : vector<2x32xf32>
    %38 = arith.mulf %26, %37 : vector<2x32xf32>
    %39 = arith.addf %35, %38 : vector<2x32xf32>
    %40 = math.tanh %39 : vector<2x32xf32>
    %cst_20 = arith.constant 1.000000e+00 : f32
    %41 = vector.broadcast %cst_20 : f32 to vector<2x32xf32>
    %42 = arith.subf %41, %34 : vector<2x32xf32>
    %43 = arith.mulf %42, %40 : vector<2x32xf32>
    %44 = arith.mulf %34, %16 : vector<2x32xf32>
    %45 = arith.addf %43, %44 : vector<2x32xf32>
    %c0_21 = arith.constant 0 : index
    %c0_22 = arith.constant 0 : index
    %46 = vector.load %arg6[%c0_21, %c0_22] : memref<16x32xf32, #tpu.memory_space<vmem>>, vector<2x32xf32>
    tpu.vector_store %arg6[%c0_21, %c0_22], %45 {strides = array<i32>} : memref<16x32xf32, #tpu.memory_space<vmem>>, vector<2x32xf32>,
    %cst_23 = arith.constant dense<0.000000e+00> : vector<2x384xf32>
    %47 = tpu.matmul %45, %5, %cst_23 {dimension_numbers = #tpu.dot_dimension_numbers<[1], [0], [0], [1], [0, 0, 1, 1], [], []>} : vector<2x32xf32>, vector<32x384xf32>, vector<2x384xf32> -> vector<2x384xf32>
    %c2 = arith.constant 2 : index
    %c0_24 = arith.constant 0 : index
    %48 = vector.load %arg5[%c2, %c0_24] : memref<16x384xf32, #tpu.memory_space<vmem>>, vector<2x384xf32>
    %49 = vector.extract_strided_slice %48 {offsets = [0, 0], sizes = [2, 32], strides = [1, 1]} : vector<2x384xf32> to vector<2x32xf32>
    %50 = vector.extract_strided_slice %47 {offsets = [0, 0], sizes = [2, 32], strides = [1, 1]} : vector<2x384xf32> to vector<2x32xf32>
    %51 = arith.addf %49, %50 : vector<2x32xf32>
    %52 = arith.negf %51 : vector<2x32xf32>
    %53 = math.exp %52 : vector<2x32xf32>
    %cst_25 = arith.constant 1.000000e+00 : f32
    %54 = vector.broadcast %cst_25 : f32 to vector<2x32xf32>
    %55 = arith.addf %54, %53 : vector<2x32xf32>
    %56 = arith.divf %54, %55 : vector<2x32xf32>
    %57 = vector.extract_strided_slice %48 {offsets = [0, 128], sizes = [2, 32], strides = [1, 1]} : vector<2x384xf32> to vector<2x32xf32>
    %58 = vector.extract_strided_slice %47 {offsets = [0, 128], sizes = [2, 32], strides = [1, 1]} : vector<2x384xf32> to vector<2x32xf32>
    %59 = arith.addf %57, %58 : vector<2x32xf32>
    %60 = arith.negf %59 : vector<2x32xf32>
    %61 = math.exp %60 : vector<2x32xf32>
    %cst_26 = arith.constant 1.000000e+00 : f32
    %62 = vector.broadcast %cst_26 : f32 to vector<2x32xf32>
    %63 = arith.addf %62, %61 : vector<2x32xf32>
    %64 = arith.divf %62, %63 : vector<2x32xf32>
    %65 = vector.extract_strided_slice %48 {offsets = [0, 256], sizes = [2, 32], strides = [1, 1]} : vector<2x384xf32> to vector<2x32xf32>
    %66 = vector.extract_strided_slice %47 {offsets = [0, 256], sizes = [2, 32], strides = [1, 1]} : vector<2x384xf32> to vector<2x32xf32>
    %67 = arith.addf %66, %10 : vector<2x32xf32>
    %68 = arith.mulf %56, %67 : vector<2x32xf32>
    %69 = arith.addf %65, %68 : vector<2x32xf32>
    %70 = math.tanh %69 : vector<2x32xf32>
    %cst_27 = arith.constant 1.000000e+00 : f32
    %71 = vector.broadcast %cst_27 : f32 to vector<2x32xf32>
    %72 = arith.subf %71, %64 : vector<2x32xf32>
    %73 = arith.mulf %72, %70 : vector<2x32xf32>
    %74 = arith.mulf %64, %45 : vector<2x32xf32>
    %75 = arith.addf %73, %74 : vector<2x32xf32>
    %c2_28 = arith.constant 2 : index
    %c0_29 = arith.constant 0 : index
    %76 = vector.load %arg6[%c2_28, %c0_29] : memref<16x32xf32, #tpu.memory_space<vmem>>, vector<2x32xf32>
    tpu.vector_store %arg6[%c2_28, %c0_29], %75 {strides = array<i32>} : memref<16x32xf32, #tpu.memory_space<vmem>>, vector<2x32xf32>,
    %cst_30 = arith.constant dense<0.000000e+00> : vector<2x384xf32>
    %77 = tpu.matmul %75, %5, %cst_30 {dimension_numbers = #tpu.dot_dimension_numbers<[1], [0], [0], [1], [0, 0, 1, 1], [], []>} : vector<2x32xf32>, vector<32x384xf32>, vector<2x384xf32> -> vector<2x384xf32>
    %c4 = arith.constant 4 : index
    %c0_31 = arith.constant 0 : index
    %78 = vector.load %arg5[%c4, %c0_31] : memref<16x384xf32, #tpu.memory_space<vmem>>, vector<2x384xf32>
    %79 = vector.extract_strided_slice %78 {offsets = [0, 0], sizes = [2, 32], strides = [1, 1]} : vector<2x384xf32> to vector<2x32xf32>
    %80 = vector.extract_strided_slice %77 {offsets = [0, 0], sizes = [2, 32], strides = [1, 1]} : vector<2x384xf32> to vector<2x32xf32>
    %81 = arith.addf %79, %80 : vector<2x32xf32>
    %82 = arith.negf %81 : vector<2x32xf32>
    %83 = math.exp %82 : vector<2x32xf32>
    %cst_32 = arith.constant 1.000000e+00 : f32
    %84 = vector.broadcast %cst_32 : f32 to vector<2x32xf32>
    %85 = arith.addf %84, %83 : vector<2x32xf32>
    %86 = arith.divf %84, %85 : vector<2x32xf32>
    %87 = vector.extract_strided_slice %78 {offsets = [0, 128], sizes = [2, 32], strides = [1, 1]} : vector<2x384xf32> to vector<2x32xf32>
    %88 = vector.extract_strided_slice %77 {offsets = [0, 128], sizes = [2, 32], strides = [1, 1]} : vector<2x384xf32> to vector<2x32xf32>
    %89 = arith.addf %87, %88 : vector<2x32xf32>
    %90 = arith.negf %89 : vector<2x32xf32>
    %91 = math.exp %90 : vector<2x32xf32>
    %cst_33 = arith.constant 1.000000e+00 : f32
    %92 = vector.broadcast %cst_33 : f32 to vector<2x32xf32>
    %93 = arith.addf %92, %91 : vector<2x32xf32>
    %94 = arith.divf %92, %93 : vector<2x32xf32>
    %95 = vector.extract_strided_slice %78 {offsets = [0, 256], sizes = [2, 32], strides = [1, 1]} : vector<2x384xf32> to vector<2x32xf32>
    %96 = vector.extract_strided_slice %77 {offsets = [0, 256], sizes = [2, 32], strides = [1, 1]} : vector<2x384xf32> to vector<2x32xf32>
    %97 = arith.addf %96, %10 : vector<2x32xf32>
    %98 = arith.mulf %86, %97 : vector<2x32xf32>
    %99 = arith.addf %95, %98 : vector<2x32xf32>
    %100 = math.tanh %99 : vector<2x32xf32>
    %cst_34 = arith.constant 1.000000e+00 : f32
    %101 = vector.broadcast %cst_34 : f32 to vector<2x32xf32>
    %102 = arith.subf %101, %94 : vector<2x32xf32>
    %103 = arith.mulf %102, %100 : vector<2x32xf32>
    %104 = arith.mulf %94, %75 : vector<2x32xf32>
    %105 = arith.addf %103, %104 : vector<2x32xf32>
    %c4_35 = arith.constant 4 : index
    %c0_36 = arith.constant 0 : index
    %106 = vector.load %arg6[%c4_35, %c0_36] : memref<16x32xf32, #tpu.memory_space<vmem>>, vector<2x32xf32>
    tpu.vector_store %arg6[%c4_35, %c0_36], %105 {strides = array<i32>} : memref<16x32xf32, #tpu.memory_space<vmem>>, vector<2x32xf32>,
    %cst_37 = arith.constant dense<0.000000e+00> : vector<2x384xf32>
    %107 = tpu.matmul %105, %5, %cst_37 {dimension_numbers = #tpu.dot_dimension_numbers<[1], [0], [0], [1], [0, 0, 1, 1], [], []>} : vector<2x32xf32>, vector<32x384xf32>, vector<2x384xf32> -> vector<2x384xf32>
    %c6 = arith.constant 6 : index
    %c0_38 = arith.constant 0 : index
    %108 = vector.load %arg5[%c6, %c0_38] : memref<16x384xf32, #tpu.memory_space<vmem>>, vector<2x384xf32>
    %109 = vector.extract_strided_slice %108 {offsets = [0, 0], sizes = [2, 32], strides = [1, 1]} : vector<2x384xf32> to vector<2x32xf32>
    %110 = vector.extract_strided_slice %107 {offsets = [0, 0], sizes = [2, 32], strides = [1, 1]} : vector<2x384xf32> to vector<2x32xf32>
    %111 = arith.addf %109, %110 : vector<2x32xf32>
    %112 = arith.negf %111 : vector<2x32xf32>
    %113 = math.exp %112 : vector<2x32xf32>
    %cst_39 = arith.constant 1.000000e+00 : f32
    %114 = vector.broadcast %cst_39 : f32 to vector<2x32xf32>
    %115 = arith.addf %114, %113 : vector<2x32xf32>
    %116 = arith.divf %114, %115 : vector<2x32xf32>
    %117 = vector.extract_strided_slice %108 {offsets = [0, 128], sizes = [2, 32], strides = [1, 1]} : vector<2x384xf32> to vector<2x32xf32>
    %118 = vector.extract_strided_slice %107 {offsets = [0, 128], sizes = [2, 32], strides = [1, 1]} : vector<2x384xf32> to vector<2x32xf32>
    %119 = arith.addf %117, %118 : vector<2x32xf32>
    %120 = arith.negf %119 : vector<2x32xf32>
    %121 = math.exp %120 : vector<2x32xf32>
    %cst_40 = arith.constant 1.000000e+00 : f32
    %122 = vector.broadcast %cst_40 : f32 to vector<2x32xf32>
    %123 = arith.addf %122, %121 : vector<2x32xf32>
    %124 = arith.divf %122, %123 : vector<2x32xf32>
    %125 = vector.extract_strided_slice %108 {offsets = [0, 256], sizes = [2, 32], strides = [1, 1]} : vector<2x384xf32> to vector<2x32xf32>
    %126 = vector.extract_strided_slice %107 {offsets = [0, 256], sizes = [2, 32], strides = [1, 1]} : vector<2x384xf32> to vector<2x32xf32>
    %127 = arith.addf %126, %10 : vector<2x32xf32>
    %128 = arith.mulf %116, %127 : vector<2x32xf32>
    %129 = arith.addf %125, %128 : vector<2x32xf32>
    %130 = math.tanh %129 : vector<2x32xf32>
    %cst_41 = arith.constant 1.000000e+00 : f32
    %131 = vector.broadcast %cst_41 : f32 to vector<2x32xf32>
    %132 = arith.subf %131, %124 : vector<2x32xf32>
    %133 = arith.mulf %132, %130 : vector<2x32xf32>
    %134 = arith.mulf %124, %105 : vector<2x32xf32>
    %135 = arith.addf %133, %134 : vector<2x32xf32>
    %c6_42 = arith.constant 6 : index
    %c0_43 = arith.constant 0 : index
    %136 = vector.load %arg6[%c6_42, %c0_43] : memref<16x32xf32, #tpu.memory_space<vmem>>, vector<2x32xf32>
    tpu.vector_store %arg6[%c6_42, %c0_43], %135 {strides = array<i32>} : memref<16x32xf32, #tpu.memory_space<vmem>>, vector<2x32xf32>,
    %cst_44 = arith.constant dense<0.000000e+00> : vector<2x384xf32>
    %137 = tpu.matmul %135, %5, %cst_44 {dimension_numbers = #tpu.dot_dimension_numbers<[1], [0], [0], [1], [0, 0, 1, 1], [], []>} : vector<2x32xf32>, vector<32x384xf32>, vector<2x384xf32> -> vector<2x384xf32>
    %c8 = arith.constant 8 : index
    %c0_45 = arith.constant 0 : index
    %138 = vector.load %arg5[%c8, %c0_45] : memref<16x384xf32, #tpu.memory_space<vmem>>, vector<2x384xf32>
    %139 = vector.extract_strided_slice %138 {offsets = [0, 0], sizes = [2, 32], strides = [1, 1]} : vector<2x384xf32> to vector<2x32xf32>
    %140 = vector.extract_strided_slice %137 {offsets = [0, 0], sizes = [2, 32], strides = [1, 1]} : vector<2x384xf32> to vector<2x32xf32>
    %141 = arith.addf %139, %140 : vector<2x32xf32>
    %142 = arith.negf %141 : vector<2x32xf32>
    %143 = math.exp %142 : vector<2x32xf32>
    %cst_46 = arith.constant 1.000000e+00 : f32
    %144 = vector.broadcast %cst_46 : f32 to vector<2x32xf32>
    %145 = arith.addf %144, %143 : vector<2x32xf32>
    %146 = arith.divf %144, %145 : vector<2x32xf32>
    %147 = vector.extract_strided_slice %138 {offsets = [0, 128], sizes = [2, 32], strides = [1, 1]} : vector<2x384xf32> to vector<2x32xf32>
    %148 = vector.extract_strided_slice %137 {offsets = [0, 128], sizes = [2, 32], strides = [1, 1]} : vector<2x384xf32> to vector<2x32xf32>
    %149 = arith.addf %147, %148 : vector<2x32xf32>
    %150 = arith.negf %149 : vector<2x32xf32>
    %151 = math.exp %150 : vector<2x32xf32>
    %cst_47 = arith.constant 1.000000e+00 : f32
    %152 = vector.broadcast %cst_47 : f32 to vector<2x32xf32>
    %153 = arith.addf %152, %151 : vector<2x32xf32>
    %154 = arith.divf %152, %153 : vector<2x32xf32>
    %155 = vector.extract_strided_slice %138 {offsets = [0, 256], sizes = [2, 32], strides = [1, 1]} : vector<2x384xf32> to vector<2x32xf32>
    %156 = vector.extract_strided_slice %137 {offsets = [0, 256], sizes = [2, 32], strides = [1, 1]} : vector<2x384xf32> to vector<2x32xf32>
    %157 = arith.addf %156, %10 : vector<2x32xf32>
    %158 = arith.mulf %146, %157 : vector<2x32xf32>
    %159 = arith.addf %155, %158 : vector<2x32xf32>
    %160 = math.tanh %159 : vector<2x32xf32>
    %cst_48 = arith.constant 1.000000e+00 : f32
    %161 = vector.broadcast %cst_48 : f32 to vector<2x32xf32>
    %162 = arith.subf %161, %154 : vector<2x32xf32>
    %163 = arith.mulf %162, %160 : vector<2x32xf32>
    %164 = arith.mulf %154, %135 : vector<2x32xf32>
    %165 = arith.addf %163, %164 : vector<2x32xf32>
    %c8_49 = arith.constant 8 : index
    %c0_50 = arith.constant 0 : index
    %166 = vector.load %arg6[%c8_49, %c0_50] : memref<16x32xf32, #tpu.memory_space<vmem>>, vector<2x32xf32>
    tpu.vector_store %arg6[%c8_49, %c0_50], %165 {strides = array<i32>} : memref<16x32xf32, #tpu.memory_space<vmem>>, vector<2x32xf32>,
    %cst_51 = arith.constant dense<0.000000e+00> : vector<2x384xf32>
    %167 = tpu.matmul %165, %5, %cst_51 {dimension_numbers = #tpu.dot_dimension_numbers<[1], [0], [0], [1], [0, 0, 1, 1], [], []>} : vector<2x32xf32>, vector<32x384xf32>, vector<2x384xf32> -> vector<2x384xf32>
    %c10 = arith.constant 10 : index
    %c0_52 = arith.constant 0 : index
    %168 = vector.load %arg5[%c10, %c0_52] : memref<16x384xf32, #tpu.memory_space<vmem>>, vector<2x384xf32>
    %169 = vector.extract_strided_slice %168 {offsets = [0, 0], sizes = [2, 32], strides = [1, 1]} : vector<2x384xf32> to vector<2x32xf32>
    %170 = vector.extract_strided_slice %167 {offsets = [0, 0], sizes = [2, 32], strides = [1, 1]} : vector<2x384xf32> to vector<2x32xf32>
    %171 = arith.addf %169, %170 : vector<2x32xf32>
    %172 = arith.negf %171 : vector<2x32xf32>
    %173 = math.exp %172 : vector<2x32xf32>
    %cst_53 = arith.constant 1.000000e+00 : f32
    %174 = vector.broadcast %cst_53 : f32 to vector<2x32xf32>
    %175 = arith.addf %174, %173 : vector<2x32xf32>
    %176 = arith.divf %174, %175 : vector<2x32xf32>
    %177 = vector.extract_strided_slice %168 {offsets = [0, 128], sizes = [2, 32], strides = [1, 1]} : vector<2x384xf32> to vector<2x32xf32>
    %178 = vector.extract_strided_slice %167 {offsets = [0, 128], sizes = [2, 32], strides = [1, 1]} : vector<2x384xf32> to vector<2x32xf32>
    %179 = arith.addf %177, %178 : vector<2x32xf32>
    %180 = arith.negf %179 : vector<2x32xf32>
    %181 = math.exp %180 : vector<2x32xf32>
    %cst_54 = arith.constant 1.000000e+00 : f32
    %182 = vector.broadcast %cst_54 : f32 to vector<2x32xf32>
    %183 = arith.addf %182, %181 : vector<2x32xf32>
    %184 = arith.divf %182, %183 : vector<2x32xf32>
    %185 = vector.extract_strided_slice %168 {offsets = [0, 256], sizes = [2, 32], strides = [1, 1]} : vector<2x384xf32> to vector<2x32xf32>
    %186 = vector.extract_strided_slice %167 {offsets = [0, 256], sizes = [2, 32], strides = [1, 1]} : vector<2x384xf32> to vector<2x32xf32>
    %187 = arith.addf %186, %10 : vector<2x32xf32>
    %188 = arith.mulf %176, %187 : vector<2x32xf32>
    %189 = arith.addf %185, %188 : vector<2x32xf32>
    %190 = math.tanh %189 : vector<2x32xf32>
    %cst_55 = arith.constant 1.000000e+00 : f32
    %191 = vector.broadcast %cst_55 : f32 to vector<2x32xf32>
    %192 = arith.subf %191, %184 : vector<2x32xf32>
    %193 = arith.mulf %192, %190 : vector<2x32xf32>
    %194 = arith.mulf %184, %165 : vector<2x32xf32>
    %195 = arith.addf %193, %194 : vector<2x32xf32>
    %c10_56 = arith.constant 10 : index
    %c0_57 = arith.constant 0 : index
    %196 = vector.load %arg6[%c10_56, %c0_57] : memref<16x32xf32, #tpu.memory_space<vmem>>, vector<2x32xf32>
    tpu.vector_store %arg6[%c10_56, %c0_57], %195 {strides = array<i32>} : memref<16x32xf32, #tpu.memory_space<vmem>>, vector<2x32xf32>,
    %cst_58 = arith.constant dense<0.000000e+00> : vector<2x384xf32>
    %197 = tpu.matmul %195, %5, %cst_58 {dimension_numbers = #tpu.dot_dimension_numbers<[1], [0], [0], [1], [0, 0, 1, 1], [], []>} : vector<2x32xf32>, vector<32x384xf32>, vector<2x384xf32> -> vector<2x384xf32>
    %c12 = arith.constant 12 : index
    %c0_59 = arith.constant 0 : index
    %198 = vector.load %arg5[%c12, %c0_59] : memref<16x384xf32, #tpu.memory_space<vmem>>, vector<2x384xf32>
    %199 = vector.extract_strided_slice %198 {offsets = [0, 0], sizes = [2, 32], strides = [1, 1]} : vector<2x384xf32> to vector<2x32xf32>
    %200 = vector.extract_strided_slice %197 {offsets = [0, 0], sizes = [2, 32], strides = [1, 1]} : vector<2x384xf32> to vector<2x32xf32>
    %201 = arith.addf %199, %200 : vector<2x32xf32>
    %202 = arith.negf %201 : vector<2x32xf32>
    %203 = math.exp %202 : vector<2x32xf32>
    %cst_60 = arith.constant 1.000000e+00 : f32
    %204 = vector.broadcast %cst_60 : f32 to vector<2x32xf32>
    %205 = arith.addf %204, %203 : vector<2x32xf32>
    %206 = arith.divf %204, %205 : vector<2x32xf32>
    %207 = vector.extract_strided_slice %198 {offsets = [0, 128], sizes = [2, 32], strides = [1, 1]} : vector<2x384xf32> to vector<2x32xf32>
    %208 = vector.extract_strided_slice %197 {offsets = [0, 128], sizes = [2, 32], strides = [1, 1]} : vector<2x384xf32> to vector<2x32xf32>
    %209 = arith.addf %207, %208 : vector<2x32xf32>
    %210 = arith.negf %209 : vector<2x32xf32>
    %211 = math.exp %210 : vector<2x32xf32>
    %cst_61 = arith.constant 1.000000e+00 : f32
    %212 = vector.broadcast %cst_61 : f32 to vector<2x32xf32>
    %213 = arith.addf %212, %211 : vector<2x32xf32>
    %214 = arith.divf %212, %213 : vector<2x32xf32>
    %215 = vector.extract_strided_slice %198 {offsets = [0, 256], sizes = [2, 32], strides = [1, 1]} : vector<2x384xf32> to vector<2x32xf32>
    %216 = vector.extract_strided_slice %197 {offsets = [0, 256], sizes = [2, 32], strides = [1, 1]} : vector<2x384xf32> to vector<2x32xf32>
    %217 = arith.addf %216, %10 : vector<2x32xf32>
    %218 = arith.mulf %206, %217 : vector<2x32xf32>
    %219 = arith.addf %215, %218 : vector<2x32xf32>
    %220 = math.tanh %219 : vector<2x32xf32>
    %cst_62 = arith.constant 1.000000e+00 : f32
    %221 = vector.broadcast %cst_62 : f32 to vector<2x32xf32>
    %222 = arith.subf %221, %214 : vector<2x32xf32>
    %223 = arith.mulf %222, %220 : vector<2x32xf32>
    %224 = arith.mulf %214, %195 : vector<2x32xf32>
    %225 = arith.addf %223, %224 : vector<2x32xf32>
    %c12_63 = arith.constant 12 : index
    %c0_64 = arith.constant 0 : index
    %226 = vector.load %arg6[%c12_63, %c0_64] : memref<16x32xf32, #tpu.memory_space<vmem>>, vector<2x32xf32>
    tpu.vector_store %arg6[%c12_63, %c0_64], %225 {strides = array<i32>} : memref<16x32xf32, #tpu.memory_space<vmem>>, vector<2x32xf32>,
    %c72 = arith.constant 72 : index
    %c0_65 = arith.constant 0 : index
    %227 = vector.load %arg2[%c72, %c0_65] : memref<144x384xf32, #tpu.memory_space<vmem>>, vector<32x384xf32>
    %c104 = arith.constant 104 : index
    %c0_66 = arith.constant 0 : index
    %228 = vector.load %arg2[%c104, %c0_66] : memref<144x384xf32, #tpu.memory_space<vmem>>, vector<32x384xf32>
    %c136 = arith.constant 136 : index
    %c0_67 = arith.constant 0 : index
    %229 = vector.load %arg2[%c136, %c0_67] : memref<144x384xf32, #tpu.memory_space<vmem>>, vector<2x384xf32>
    %230 = vector.extract_strided_slice %229 {offsets = [0, 0], sizes = [1, 384], strides = [1, 1]} : vector<2x384xf32> to vector<1x384xf32>
    %231 = vector.extract_strided_slice %229 {offsets = [1, 256], sizes = [1, 32], strides = [1, 1]} : vector<2x384xf32> to vector<1x32xf32>
    %232 = vector.shape_cast %231 : vector<1x32xf32> to vector<1x32xf32>
    %233 = vector.broadcast %232 : vector<1x32xf32> to vector<2x32xf32>
    %c0_68 = arith.constant 0 : index
    %c0_69 = arith.constant 0 : index
    %234 = vector.load %arg6[%c0_68, %c0_69] : memref<16x32xf32, #tpu.memory_space<vmem>>, vector<16x32xf32>
    %cst_70 = arith.constant dense<0.000000e+00> : vector<16x384xf32>
    %235 = tpu.matmul %234, %227, %cst_70 {dimension_numbers = #tpu.dot_dimension_numbers<[1], [0], [0], [1], [0, 0, 1, 1], [], []>} : vector<16x32xf32>, vector<32x384xf32>, vector<16x384xf32> -> vector<16x384xf32>
    %236 = vector.broadcast %230 : vector<1x384xf32> to vector<16x384xf32>
    %237 = arith.addf %235, %236 : vector<16x384xf32>
    %c0_71 = arith.constant 0 : index
    %c0_72 = arith.constant 0 : index
    %238 = vector.load %arg5[%c0_71, %c0_72] : memref<16x384xf32, #tpu.memory_space<vmem>>, vector<16x384xf32>
    tpu.vector_store %arg5[%c0_71, %c0_72], %237 {strides = array<i32>} : memref<16x384xf32, #tpu.memory_space<vmem>>, vector<16x384xf32>,
    %cst_73 = arith.constant 0.000000e+00 : f32
    %239 = vector.broadcast %cst_73 : f32 to vector<2x32xf32>
    %cst_74 = arith.constant dense<0.000000e+00> : vector<2x384xf32>
    %240 = tpu.matmul %239, %228, %cst_74 {dimension_numbers = #tpu.dot_dimension_numbers<[1], [0], [0], [1], [0, 0, 1, 1], [], []>} : vector<2x32xf32>, vector<32x384xf32>, vector<2x384xf32> -> vector<2x384xf32>
    %c0_75 = arith.constant 0 : index
    %c0_76 = arith.constant 0 : index
    %241 = vector.load %arg5[%c0_75, %c0_76] : memref<16x384xf32, #tpu.memory_space<vmem>>, vector<2x384xf32>
    %242 = vector.extract_strided_slice %241 {offsets = [0, 0], sizes = [2, 32], strides = [1, 1]} : vector<2x384xf32> to vector<2x32xf32>
    %243 = vector.extract_strided_slice %240 {offsets = [0, 0], sizes = [2, 32], strides = [1, 1]} : vector<2x384xf32> to vector<2x32xf32>
    %244 = arith.addf %242, %243 : vector<2x32xf32>
    %245 = arith.negf %244 : vector<2x32xf32>
    %246 = math.exp %245 : vector<2x32xf32>
    %cst_77 = arith.constant 1.000000e+00 : f32
    %247 = vector.broadcast %cst_77 : f32 to vector<2x32xf32>
    %248 = arith.addf %247, %246 : vector<2x32xf32>
    %249 = arith.divf %247, %248 : vector<2x32xf32>
    %250 = vector.extract_strided_slice %241 {offsets = [0, 128], sizes = [2, 32], strides = [1, 1]} : vector<2x384xf32> to vector<2x32xf32>
    %251 = vector.extract_strided_slice %240 {offsets = [0, 128], sizes = [2, 32], strides = [1, 1]} : vector<2x384xf32> to vector<2x32xf32>
    %252 = arith.addf %250, %251 : vector<2x32xf32>
    %253 = arith.negf %252 : vector<2x32xf32>
    %254 = math.exp %253 : vector<2x32xf32>
    %cst_78 = arith.constant 1.000000e+00 : f32
    %255 = vector.broadcast %cst_78 : f32 to vector<2x32xf32>
    %256 = arith.addf %255, %254 : vector<2x32xf32>
    %257 = arith.divf %255, %256 : vector<2x32xf32>
    %258 = vector.extract_strided_slice %241 {offsets = [0, 256], sizes = [2, 32], strides = [1, 1]} : vector<2x384xf32> to vector<2x32xf32>
    %259 = vector.extract_strided_slice %240 {offsets = [0, 256], sizes = [2, 32], strides = [1, 1]} : vector<2x384xf32> to vector<2x32xf32>
    %260 = arith.addf %259, %233 : vector<2x32xf32>
    %261 = arith.mulf %249, %260 : vector<2x32xf32>
    %262 = arith.addf %258, %261 : vector<2x32xf32>
    %263 = math.tanh %262 : vector<2x32xf32>
    %cst_79 = arith.constant 1.000000e+00 : f32
    %264 = vector.broadcast %cst_79 : f32 to vector<2x32xf32>
    %265 = arith.subf %264, %257 : vector<2x32xf32>
    %266 = arith.mulf %265, %263 : vector<2x32xf32>
    %267 = arith.mulf %257, %239 : vector<2x32xf32>
    %268 = arith.addf %266, %267 : vector<2x32xf32>
    %c4_80 = arith.constant 4 : index
    %c0_81 = arith.constant 0 : index
    %269 = vector.load %arg7[%c4_80, %c0_81] : memref<18x32xf32, #tpu.memory_space<vmem>>, vector<2x32xf32>
    tpu.vector_store %arg7[%c4_80, %c0_81], %268 {strides = array<i32>} : memref<18x32xf32, #tpu.memory_space<vmem>>, vector<2x32xf32>,
    %cst_82 = arith.constant dense<0.000000e+00> : vector<2x384xf32>
    %270 = tpu.matmul %268, %228, %cst_82 {dimension_numbers = #tpu.dot_dimension_numbers<[1], [0], [0], [1], [0, 0, 1, 1], [], []>} : vector<2x32xf32>, vector<32x384xf32>, vector<2x384xf32> -> vector<2x384xf32>
    %c2_83 = arith.constant 2 : index
    %c0_84 = arith.constant 0 : index
    %271 = vector.load %arg5[%c2_83, %c0_84] : memref<16x384xf32, #tpu.memory_space<vmem>>, vector<2x384xf32>
    %272 = vector.extract_strided_slice %271 {offsets = [0, 0], sizes = [2, 32], strides = [1, 1]} : vector<2x384xf32> to vector<2x32xf32>
    %273 = vector.extract_strided_slice %270 {offsets = [0, 0], sizes = [2, 32], strides = [1, 1]} : vector<2x384xf32> to vector<2x32xf32>
    %274 = arith.addf %272, %273 : vector<2x32xf32>
    %275 = arith.negf %274 : vector<2x32xf32>
    %276 = math.exp %275 : vector<2x32xf32>
    %cst_85 = arith.constant 1.000000e+00 : f32
    %277 = vector.broadcast %cst_85 : f32 to vector<2x32xf32>
    %278 = arith.addf %277, %276 : vector<2x32xf32>
    %279 = arith.divf %277, %278 : vector<2x32xf32>
    %280 = vector.extract_strided_slice %271 {offsets = [0, 128], sizes = [2, 32], strides = [1, 1]} : vector<2x384xf32> to vector<2x32xf32>
    %281 = vector.extract_strided_slice %270 {offsets = [0, 128], sizes = [2, 32], strides = [1, 1]} : vector<2x384xf32> to vector<2x32xf32>
    %282 = arith.addf %280, %281 : vector<2x32xf32>
    %283 = arith.negf %282 : vector<2x32xf32>
    %284 = math.exp %283 : vector<2x32xf32>
    %cst_86 = arith.constant 1.000000e+00 : f32
    %285 = vector.broadcast %cst_86 : f32 to vector<2x32xf32>
    %286 = arith.addf %285, %284 : vector<2x32xf32>
    %287 = arith.divf %285, %286 : vector<2x32xf32>
    %288 = vector.extract_strided_slice %271 {offsets = [0, 256], sizes = [2, 32], strides = [1, 1]} : vector<2x384xf32> to vector<2x32xf32>
    %289 = vector.extract_strided_slice %270 {offsets = [0, 256], sizes = [2, 32], strides = [1, 1]} : vector<2x384xf32> to vector<2x32xf32>
    %290 = arith.addf %289, %233 : vector<2x32xf32>
    %291 = arith.mulf %279, %290 : vector<2x32xf32>
    %292 = arith.addf %288, %291 : vector<2x32xf32>
    %293 = math.tanh %292 : vector<2x32xf32>
    %cst_87 = arith.constant 1.000000e+00 : f32
    %294 = vector.broadcast %cst_87 : f32 to vector<2x32xf32>
    %295 = arith.subf %294, %287 : vector<2x32xf32>
    %296 = arith.mulf %295, %293 : vector<2x32xf32>
    %297 = arith.mulf %287, %268 : vector<2x32xf32>
    %298 = arith.addf %296, %297 : vector<2x32xf32>
    %c6_88 = arith.constant 6 : index
    %c0_89 = arith.constant 0 : index
    %299 = vector.load %arg7[%c6_88, %c0_89] : memref<18x32xf32, #tpu.memory_space<vmem>>, vector<2x32xf32>
    tpu.vector_store %arg7[%c6_88, %c0_89], %298 {strides = array<i32>} : memref<18x32xf32, #tpu.memory_space<vmem>>, vector<2x32xf32>,
    %cst_90 = arith.constant dense<0.000000e+00> : vector<2x384xf32>
    %300 = tpu.matmul %298, %228, %cst_90 {dimension_numbers = #tpu.dot_dimension_numbers<[1], [0], [0], [1], [0, 0, 1, 1], [], []>} : vector<2x32xf32>, vector<32x384xf32>, vector<2x384xf32> -> vector<2x384xf32>
    %c4_91 = arith.constant 4 : index
    %c0_92 = arith.constant 0 : index
    %301 = vector.load %arg5[%c4_91, %c0_92] : memref<16x384xf32, #tpu.memory_space<vmem>>, vector<2x384xf32>
    %302 = vector.extract_strided_slice %301 {offsets = [0, 0], sizes = [2, 32], strides = [1, 1]} : vector<2x384xf32> to vector<2x32xf32>
    %303 = vector.extract_strided_slice %300 {offsets = [0, 0], sizes = [2, 32], strides = [1, 1]} : vector<2x384xf32> to vector<2x32xf32>
    %304 = arith.addf %302, %303 : vector<2x32xf32>
    %305 = arith.negf %304 : vector<2x32xf32>
    %306 = math.exp %305 : vector<2x32xf32>
    %cst_93 = arith.constant 1.000000e+00 : f32
    %307 = vector.broadcast %cst_93 : f32 to vector<2x32xf32>
    %308 = arith.addf %307, %306 : vector<2x32xf32>
    %309 = arith.divf %307, %308 : vector<2x32xf32>
    %310 = vector.extract_strided_slice %301 {offsets = [0, 128], sizes = [2, 32], strides = [1, 1]} : vector<2x384xf32> to vector<2x32xf32>
    %311 = vector.extract_strided_slice %300 {offsets = [0, 128], sizes = [2, 32], strides = [1, 1]} : vector<2x384xf32> to vector<2x32xf32>
    %312 = arith.addf %310, %311 : vector<2x32xf32>
    %313 = arith.negf %312 : vector<2x32xf32>
    %314 = math.exp %313 : vector<2x32xf32>
    %cst_94 = arith.constant 1.000000e+00 : f32
    %315 = vector.broadcast %cst_94 : f32 to vector<2x32xf32>
    %316 = arith.addf %315, %314 : vector<2x32xf32>
    %317 = arith.divf %315, %316 : vector<2x32xf32>
    %318 = vector.extract_strided_slice %301 {offsets = [0, 256], sizes = [2, 32], strides = [1, 1]} : vector<2x384xf32> to vector<2x32xf32>
    %319 = vector.extract_strided_slice %300 {offsets = [0, 256], sizes = [2, 32], strides = [1, 1]} : vector<2x384xf32> to vector<2x32xf32>
    %320 = arith.addf %319, %233 : vector<2x32xf32>
    %321 = arith.mulf %309, %320 : vector<2x32xf32>
    %322 = arith.addf %318, %321 : vector<2x32xf32>
    %323 = math.tanh %322 : vector<2x32xf32>
    %cst_95 = arith.constant 1.000000e+00 : f32
    %324 = vector.broadcast %cst_95 : f32 to vector<2x32xf32>
    %325 = arith.subf %324, %317 : vector<2x32xf32>
    %326 = arith.mulf %325, %323 : vector<2x32xf32>
    %327 = arith.mulf %317, %298 : vector<2x32xf32>
    %328 = arith.addf %326, %327 : vector<2x32xf32>
    %c8_96 = arith.constant 8 : index
    %c0_97 = arith.constant 0 : index
    %329 = vector.load %arg7[%c8_96, %c0_97] : memref<18x32xf32, #tpu.memory_space<vmem>>, vector<2x32xf32>
    tpu.vector_store %arg7[%c8_96, %c0_97], %328 {strides = array<i32>} : memref<18x32xf32, #tpu.memory_space<vmem>>, vector<2x32xf32>,
    %cst_98 = arith.constant dense<0.000000e+00> : vector<2x384xf32>
    %330 = tpu.matmul %328, %228, %cst_98 {dimension_numbers = #tpu.dot_dimension_numbers<[1], [0], [0], [1], [0, 0, 1, 1], [], []>} : vector<2x32xf32>, vector<32x384xf32>, vector<2x384xf32> -> vector<2x384xf32>
    %c6_99 = arith.constant 6 : index
    %c0_100 = arith.constant 0 : index
    %331 = vector.load %arg5[%c6_99, %c0_100] : memref<16x384xf32, #tpu.memory_space<vmem>>, vector<2x384xf32>
    %332 = vector.extract_strided_slice %331 {offsets = [0, 0], sizes = [2, 32], strides = [1, 1]} : vector<2x384xf32> to vector<2x32xf32>
    %333 = vector.extract_strided_slice %330 {offsets = [0, 0], sizes = [2, 32], strides = [1, 1]} : vector<2x384xf32> to vector<2x32xf32>
    %334 = arith.addf %332, %333 : vector<2x32xf32>
    %335 = arith.negf %334 : vector<2x32xf32>
    %336 = math.exp %335 : vector<2x32xf32>
    %cst_101 = arith.constant 1.000000e+00 : f32
    %337 = vector.broadcast %cst_101 : f32 to vector<2x32xf32>
    %338 = arith.addf %337, %336 : vector<2x32xf32>
    %339 = arith.divf %337, %338 : vector<2x32xf32>
    %340 = vector.extract_strided_slice %331 {offsets = [0, 128], sizes = [2, 32], strides = [1, 1]} : vector<2x384xf32> to vector<2x32xf32>
    %341 = vector.extract_strided_slice %330 {offsets = [0, 128], sizes = [2, 32], strides = [1, 1]} : vector<2x384xf32> to vector<2x32xf32>
    %342 = arith.addf %340, %341 : vector<2x32xf32>
    %343 = arith.negf %342 : vector<2x32xf32>
    %344 = math.exp %343 : vector<2x32xf32>
    %cst_102 = arith.constant 1.000000e+00 : f32
    %345 = vector.broadcast %cst_102 : f32 to vector<2x32xf32>
    %346 = arith.addf %345, %344 : vector<2x32xf32>
    %347 = arith.divf %345, %346 : vector<2x32xf32>
    %348 = vector.extract_strided_slice %331 {offsets = [0, 256], sizes = [2, 32], strides = [1, 1]} : vector<2x384xf32> to vector<2x32xf32>
    %349 = vector.extract_strided_slice %330 {offsets = [0, 256], sizes = [2, 32], strides = [1, 1]} : vector<2x384xf32> to vector<2x32xf32>
    %350 = arith.addf %349, %233 : vector<2x32xf32>
    %351 = arith.mulf %339, %350 : vector<2x32xf32>
    %352 = arith.addf %348, %351 : vector<2x32xf32>
    %353 = math.tanh %352 : vector<2x32xf32>
    %cst_103 = arith.constant 1.000000e+00 : f32
    %354 = vector.broadcast %cst_103 : f32 to vector<2x32xf32>
    %355 = arith.subf %354, %347 : vector<2x32xf32>
    %356 = arith.mulf %355, %353 : vector<2x32xf32>
    %357 = arith.mulf %347, %328 : vector<2x32xf32>
    %358 = arith.addf %356, %357 : vector<2x32xf32>
    %c10_104 = arith.constant 10 : index
    %c0_105 = arith.constant 0 : index
    %359 = vector.load %arg7[%c10_104, %c0_105] : memref<18x32xf32, #tpu.memory_space<vmem>>, vector<2x32xf32>
    tpu.vector_store %arg7[%c10_104, %c0_105], %358 {strides = array<i32>} : memref<18x32xf32, #tpu.memory_space<vmem>>, vector<2x32xf32>,
    %cst_106 = arith.constant dense<0.000000e+00> : vector<2x384xf32>
    %360 = tpu.matmul %358, %228, %cst_106 {dimension_numbers = #tpu.dot_dimension_numbers<[1], [0], [0], [1], [0, 0, 1, 1], [], []>} : vector<2x32xf32>, vector<32x384xf32>, vector<2x384xf32> -> vector<2x384xf32>
    %c8_107 = arith.constant 8 : index
    %c0_108 = arith.constant 0 : index
    %361 = vector.load %arg5[%c8_107, %c0_108] : memref<16x384xf32, #tpu.memory_space<vmem>>, vector<2x384xf32>
    %362 = vector.extract_strided_slice %361 {offsets = [0, 0], sizes = [2, 32], strides = [1, 1]} : vector<2x384xf32> to vector<2x32xf32>
    %363 = vector.extract_strided_slice %360 {offsets = [0, 0], sizes = [2, 32], strides = [1, 1]} : vector<2x384xf32> to vector<2x32xf32>
    %364 = arith.addf %362, %363 : vector<2x32xf32>
    %365 = arith.negf %364 : vector<2x32xf32>
    %366 = math.exp %365 : vector<2x32xf32>
    %cst_109 = arith.constant 1.000000e+00 : f32
    %367 = vector.broadcast %cst_109 : f32 to vector<2x32xf32>
    %368 = arith.addf %367, %366 : vector<2x32xf32>
    %369 = arith.divf %367, %368 : vector<2x32xf32>
    %370 = vector.extract_strided_slice %361 {offsets = [0, 128], sizes = [2, 32], strides = [1, 1]} : vector<2x384xf32> to vector<2x32xf32>
    %371 = vector.extract_strided_slice %360 {offsets = [0, 128], sizes = [2, 32], strides = [1, 1]} : vector<2x384xf32> to vector<2x32xf32>
    %372 = arith.addf %370, %371 : vector<2x32xf32>
    %373 = arith.negf %372 : vector<2x32xf32>
    %374 = math.exp %373 : vector<2x32xf32>
    %cst_110 = arith.constant 1.000000e+00 : f32
    %375 = vector.broadcast %cst_110 : f32 to vector<2x32xf32>
    %376 = arith.addf %375, %374 : vector<2x32xf32>
    %377 = arith.divf %375, %376 : vector<2x32xf32>
    %378 = vector.extract_strided_slice %361 {offsets = [0, 256], sizes = [2, 32], strides = [1, 1]} : vector<2x384xf32> to vector<2x32xf32>
    %379 = vector.extract_strided_slice %360 {offsets = [0, 256], sizes = [2, 32], strides = [1, 1]} : vector<2x384xf32> to vector<2x32xf32>
    %380 = arith.addf %379, %233 : vector<2x32xf32>
    %381 = arith.mulf %369, %380 : vector<2x32xf32>
    %382 = arith.addf %378, %381 : vector<2x32xf32>
    %383 = math.tanh %382 : vector<2x32xf32>
    %cst_111 = arith.constant 1.000000e+00 : f32
    %384 = vector.broadcast %cst_111 : f32 to vector<2x32xf32>
    %385 = arith.subf %384, %377 : vector<2x32xf32>
    %386 = arith.mulf %385, %383 : vector<2x32xf32>
    %387 = arith.mulf %377, %358 : vector<2x32xf32>
    %388 = arith.addf %386, %387 : vector<2x32xf32>
    %c12_112 = arith.constant 12 : index
    %c0_113 = arith.constant 0 : index
    %389 = vector.load %arg7[%c12_112, %c0_113] : memref<18x32xf32, #tpu.memory_space<vmem>>, vector<2x32xf32>
    tpu.vector_store %arg7[%c12_112, %c0_113], %388 {strides = array<i32>} : memref<18x32xf32, #tpu.memory_space<vmem>>, vector<2x32xf32>,
    %cst_114 = arith.constant dense<0.000000e+00> : vector<2x384xf32>
    %390 = tpu.matmul %388, %228, %cst_114 {dimension_numbers = #tpu.dot_dimension_numbers<[1], [0], [0], [1], [0, 0, 1, 1], [], []>} : vector<2x32xf32>, vector<32x384xf32>, vector<2x384xf32> -> vector<2x384xf32>
    %c10_115 = arith.constant 10 : index
    %c0_116 = arith.constant 0 : index
    %391 = vector.load %arg5[%c10_115, %c0_116] : memref<16x384xf32, #tpu.memory_space<vmem>>, vector<2x384xf32>
    %392 = vector.extract_strided_slice %391 {offsets = [0, 0], sizes = [2, 32], strides = [1, 1]} : vector<2x384xf32> to vector<2x32xf32>
    %393 = vector.extract_strided_slice %390 {offsets = [0, 0], sizes = [2, 32], strides = [1, 1]} : vector<2x384xf32> to vector<2x32xf32>
    %394 = arith.addf %392, %393 : vector<2x32xf32>
    %395 = arith.negf %394 : vector<2x32xf32>
    %396 = math.exp %395 : vector<2x32xf32>
    %cst_117 = arith.constant 1.000000e+00 : f32
    %397 = vector.broadcast %cst_117 : f32 to vector<2x32xf32>
    %398 = arith.addf %397, %396 : vector<2x32xf32>
    %399 = arith.divf %397, %398 : vector<2x32xf32>
    %400 = vector.extract_strided_slice %391 {offsets = [0, 128], sizes = [2, 32], strides = [1, 1]} : vector<2x384xf32> to vector<2x32xf32>
    %401 = vector.extract_strided_slice %390 {offsets = [0, 128], sizes = [2, 32], strides = [1, 1]} : vector<2x384xf32> to vector<2x32xf32>
    %402 = arith.addf %400, %401 : vector<2x32xf32>
    %403 = arith.negf %402 : vector<2x32xf32>
    %404 = math.exp %403 : vector<2x32xf32>
    %cst_118 = arith.constant 1.000000e+00 : f32
    %405 = vector.broadcast %cst_118 : f32 to vector<2x32xf32>
    %406 = arith.addf %405, %404 : vector<2x32xf32>
    %407 = arith.divf %405, %406 : vector<2x32xf32>
    %408 = vector.extract_strided_slice %391 {offsets = [0, 256], sizes = [2, 32], strides = [1, 1]} : vector<2x384xf32> to vector<2x32xf32>
    %409 = vector.extract_strided_slice %390 {offsets = [0, 256], sizes = [2, 32], strides = [1, 1]} : vector<2x384xf32> to vector<2x32xf32>
    %410 = arith.addf %409, %233 : vector<2x32xf32>
    %411 = arith.mulf %399, %410 : vector<2x32xf32>
    %412 = arith.addf %408, %411 : vector<2x32xf32>
    %413 = math.tanh %412 : vector<2x32xf32>
    %cst_119 = arith.constant 1.000000e+00 : f32
    %414 = vector.broadcast %cst_119 : f32 to vector<2x32xf32>
    %415 = arith.subf %414, %407 : vector<2x32xf32>
    %416 = arith.mulf %415, %413 : vector<2x32xf32>
    %417 = arith.mulf %407, %388 : vector<2x32xf32>
    %418 = arith.addf %416, %417 : vector<2x32xf32>
    %c14 = arith.constant 14 : index
    %c0_120 = arith.constant 0 : index
    %419 = vector.load %arg7[%c14, %c0_120] : memref<18x32xf32, #tpu.memory_space<vmem>>, vector<2x32xf32>
    tpu.vector_store %arg7[%c14, %c0_120], %418 {strides = array<i32>} : memref<18x32xf32, #tpu.memory_space<vmem>>, vector<2x32xf32>,
    %cst_121 = arith.constant dense<0.000000e+00> : vector<2x384xf32>
    %420 = tpu.matmul %418, %228, %cst_121 {dimension_numbers = #tpu.dot_dimension_numbers<[1], [0], [0], [1], [0, 0, 1, 1], [], []>} : vector<2x32xf32>, vector<32x384xf32>, vector<2x384xf32> -> vector<2x384xf32>
    %c12_122 = arith.constant 12 : index
    %c0_123 = arith.constant 0 : index
    %421 = vector.load %arg5[%c12_122, %c0_123] : memref<16x384xf32, #tpu.memory_space<vmem>>, vector<2x384xf32>
    %422 = vector.extract_strided_slice %421 {offsets = [0, 0], sizes = [2, 32], strides = [1, 1]} : vector<2x384xf32> to vector<2x32xf32>
    %423 = vector.extract_strided_slice %420 {offsets = [0, 0], sizes = [2, 32], strides = [1, 1]} : vector<2x384xf32> to vector<2x32xf32>
    %424 = arith.addf %422, %423 : vector<2x32xf32>
    %425 = arith.negf %424 : vector<2x32xf32>
    %426 = math.exp %425 : vector<2x32xf32>
    %cst_124 = arith.constant 1.000000e+00 : f32
    %427 = vector.broadcast %cst_124 : f32 to vector<2x32xf32>
    %428 = arith.addf %427, %426 : vector<2x32xf32>
    %429 = arith.divf %427, %428 : vector<2x32xf32>
    %430 = vector.extract_strided_slice %421 {offsets = [0, 128], sizes = [2, 32], strides = [1, 1]} : vector<2x384xf32> to vector<2x32xf32>
    %431 = vector.extract_strided_slice %420 {offsets = [0, 128], sizes = [2, 32], strides = [1, 1]} : vector<2x384xf32> to vector<2x32xf32>
    %432 = arith.addf %430, %431 : vector<2x32xf32>
    %433 = arith.negf %432 : vector<2x32xf32>
    %434 = math.exp %433 : vector<2x32xf32>
    %cst_125 = arith.constant 1.000000e+00 : f32
    %435 = vector.broadcast %cst_125 : f32 to vector<2x32xf32>
    %436 = arith.addf %435, %434 : vector<2x32xf32>
    %437 = arith.divf %435, %436 : vector<2x32xf32>
    %438 = vector.extract_strided_slice %421 {offsets = [0, 256], sizes = [2, 32], strides = [1, 1]} : vector<2x384xf32> to vector<2x32xf32>
    %439 = vector.extract_strided_slice %420 {offsets = [0, 256], sizes = [2, 32], strides = [1, 1]} : vector<2x384xf32> to vector<2x32xf32>
    %440 = arith.addf %439, %233 : vector<2x32xf32>
    %441 = arith.mulf %429, %440 : vector<2x32xf32>
    %442 = arith.addf %438, %441 : vector<2x32xf32>
    %443 = math.tanh %442 : vector<2x32xf32>
    %cst_126 = arith.constant 1.000000e+00 : f32
    %444 = vector.broadcast %cst_126 : f32 to vector<2x32xf32>
    %445 = arith.subf %444, %437 : vector<2x32xf32>
    %446 = arith.mulf %445, %443 : vector<2x32xf32>
    %447 = arith.mulf %437, %418 : vector<2x32xf32>
    %448 = arith.addf %446, %447 : vector<2x32xf32>
    %c16 = arith.constant 16 : index
    %c0_127 = arith.constant 0 : index
    %449 = vector.load %arg7[%c16, %c0_127] : memref<18x32xf32, #tpu.memory_space<vmem>>, vector<2x32xf32>
    tpu.vector_store %arg7[%c16, %c0_127], %448 {strides = array<i32>} : memref<18x32xf32, #tpu.memory_space<vmem>>, vector<2x32xf32>,
    %c0_128 = arith.constant 0 : index
    %c0_129 = arith.constant 0 : index
    %450 = vector.load %arg3[%c0_128, %c0_129] : memref<66x256xf32, #tpu.memory_space<vmem>>, vector<32x32xf32>
    %c32_130 = arith.constant 32 : index
    %c0_131 = arith.constant 0 : index
    %451 = vector.load %arg3[%c32_130, %c0_131] : memref<66x256xf32, #tpu.memory_space<vmem>>, vector<32x256xf32>
    %c64_132 = arith.constant 64 : index
    %c0_133 = arith.constant 0 : index
    %452 = vector.load %arg3[%c64_132, %c0_133] : memref<66x256xf32, #tpu.memory_space<vmem>>, vector<1x32xf32>
    %c65 = arith.constant 65 : index
    %c0_134 = arith.constant 0 : index
    %453 = vector.load %arg3[%c65, %c0_134] : memref<66x256xf32, #tpu.memory_space<vmem>>, vector<1x256xf32>
    %c0_135 = arith.constant 0 : index
    %c0_136 = arith.constant 0 : index
    %454 = vector.load %arg7[%c0_135, %c0_136] : memref<18x32xf32, #tpu.memory_space<vmem>>, vector<18x32xf32>
    %cst_137 = arith.constant dense<0.000000e+00> : vector<18x32xf32>
    %455 = tpu.matmul %454, %450, %cst_137 {dimension_numbers = #tpu.dot_dimension_numbers<[1], [0], [0], [1], [0, 0, 1, 1], [], []>} : vector<18x32xf32>, vector<32x32xf32>, vector<18x32xf32> -> vector<18x32xf32>
    %456 = vector.broadcast %452 : vector<1x32xf32> to vector<18x32xf32>
    %457 = arith.addf %455, %456 : vector<18x32xf32>
    %cst_138 = arith.constant 0.000000e+00 : f32
    %458 = vector.broadcast %cst_138 : f32 to vector<18x32xf32>
    %459 = arith.maximumf %457, %458 : vector<18x32xf32>
    %cst_139 = arith.constant dense<0.000000e+00> : vector<18x256xf32>
    %460 = tpu.matmul %459, %451, %cst_139 {dimension_numbers = #tpu.dot_dimension_numbers<[1], [0], [0], [1], [0, 0, 1, 1], [], []>} : vector<18x32xf32>, vector<32x256xf32>, vector<18x256xf32> -> vector<18x256xf32>
    %461 = vector.broadcast %453 : vector<1x256xf32> to vector<18x256xf32>
    %462 = arith.addf %460, %461 : vector<18x256xf32>
    %463 = vector.extract_strided_slice %462 {offsets = [0, 0], sizes = [18, 128], strides = [1, 1]} : vector<18x256xf32> to vector<18x128xf32>
    %c0_140 = arith.constant 0 : index
    %c0_141 = arith.constant 0 : index
    %464 = vector.load %arg4[%c0_140, %c0_141] : memref<18x256xf32, #tpu.memory_space<vmem>>, vector<18x128xf32>
    tpu.vector_store %arg4[%c0_140, %c0_141], %463 {strides = array<i32>} : memref<18x256xf32, #tpu.memory_space<vmem>>, vector<18x128xf32>,
    %465 = vector.extract_strided_slice %462 {offsets = [0, 128], sizes = [18, 128], strides = [1, 1]} : vector<18x256xf32> to vector<18x128xf32>
    %cst_142 = arith.constant 0.000000e+00 : f32
    %466 = vector.broadcast %cst_142 : f32 to vector<18x128xf32>
    %467 = arith.maximumf %465, %466 : vector<18x128xf32>
    %468 = math.absf %465 : vector<18x128xf32>
    %cst_143 = arith.constant 0.000000e+00 : f32
    %469 = vector.broadcast %cst_143 : f32 to vector<18x128xf32>
    %470 = arith.subf %469, %468 : vector<18x128xf32>
    %471 = math.exp %470 : vector<18x128xf32>
    %472 = math.log1p %471 : vector<18x128xf32>
    %473 = arith.addf %467, %472 : vector<18x128xf32>
    %c0_144 = arith.constant 0 : index
    %c128 = arith.constant 128 : index
    %474 = vector.load %arg4[%c0_144, %c128] : memref<18x256xf32, #tpu.memory_space<vmem>>, vector<18x128xf32>
    tpu.vector_store %arg4[%c0_144, %c128], %473 {strides = array<i32>} : memref<18x256xf32, #tpu.memory_space<vmem>>, vector<18x128xf32>,
    return
  }
}

</mosaic_0001>

<bundles_post_ra>
// kernel: danse_forward.1
= control target key start
LH: loop header
LB: loop body
LE: loop exit
PB: predicated region body
PF: predicated region fallthrough
CT: control target
= control target key end

     0   :  { %9 = vsyncpa [#allocation6], 0  ;;  %s2981_s0 = inlined_call_operand.vmem [shape: f32[16,32], index: 0, kind: input, shape index: {}]   ;;  %s2982_s1 = inlined_call_operand.vmem [shape: f32[4,32], index: 1, kind: input, shape index: {}]   ;;  %s2983_s2 = inlined_call_operand.hbm [shape: f32[144,384], index: 2, kind: input, shape index: {}]   ;;  %s2984_s3 = inlined_call_operand.hbm [shape: f32[66,256], index: 3, kind: input, shape index: {}]   ;;  %s2985_s4 = inlined_call_operand.vmem [shape: f32[18,256], index: 4, kind: output, shape index: {}]  }
   0x1   :  { %s19_s17 = sshll.u32 %s2983_s2, 4  ;;  %s20_s17 = int_to_ptr.hbm [resolvable:$true] %s19_s17 }
   0x2   :  { %10 = vsyncpa [#allocation8], 0  ;;  %s2489_s18 = smov [#allocation5]   ;;  %s32_s22 = sshll.u32 %s2984_s3, 4  ;;  %s33_s22 = int_to_ptr.hbm [resolvable:$true] %s32_s22 }
   0x3   :  { %s21_s19 = sshll.u32 %s2489_s18, 4  ;;  %s2490_s23 = smov 384   ;;  %s22_s19 = int_to_ptr.vmem [resolvable:$true] %s21_s19 }
   0x4   :  { %s2491_s24 = smov 24   ;;  %s2492_s25 = smov [#allocation7]  }
   0x5   :  { %27 = dma.hbm_to_vmem [thread:$0]  %s20_s17, 6912, %s22_s19, [#allocation6], %s2490_s23, %s2490_s23, %s2491_s24  }
   0x6   :  { %s34_s26 = sshll.u32 %s2492_s25, 4  ;;  %s2493_s27 = smov 256   ;;  %s35_s26 = int_to_ptr.vmem [resolvable:$true] %s34_s26 }
   0x7   :  { %s2494_s28 = smov 16  }
   0x8   :  { %40 = dma.hbm_to_vmem [thread:$0]  %s33_s22, 2304, %s35_s26, [#allocation8], %s2493_s27, %s2493_s27, %s2494_s28  }
   0x9   :  { %2485 = dma.done.wait [#allocation6], 6912  }
   0xa   :  { %2486 = vsyncadd [#allocation6], 4294960384 }
   0xb   :  { %2487 = dma.done.wait [#allocation8], 2304  }
   0xc   :  { %2488 = vsyncadd [#allocation8], 4294964992  ;;  %vm52_vm0 = vcmask 261120   ;;  %v2495_v0 = vmov 0.0   ;;  %v64_v1 = vld [vmem:[#allocation5 + $0x48] sm:$0xff]  ;;  %v61_v2 = vld [vmem:[#allocation5 + $0x30] sm:$0xff] }
   0xd   :  { %53 = vst.msk [vmem:[#allocation3] sm:$0xff] %vm52_vm0, %v2495_v0  ;;  %106 = vmatpush.msra.mxu1 %v64_v1  ;;  %v2531_v3 = vld [vmem:[#allocation5 + $0xa8] sm:$0xff]  ;;  %v2533_v4 = vld [vmem:[#allocation5 + $0x90] sm:$0xff]  ;;  %v58_v5 = vld [vmem:[#allocation5 + $0x18] sm:$0xff]  ;;  %vm283_vm9 = vcmask 254976  }
   0xe   :  { %54 = vst.msk [vmem:[#allocation3 + $0x8] sm:$0xff] %vm52_vm0, %v2495_v0  ;;  %184 = vmatpush.msra.mxu3 %v2531_v3  ;;  %v2536_v6 = vld [vmem:[#allocation5 + $0x78] sm:$0xff]  ;;  %v55_v7 = vld [vmem:[#allocation5] sm:$0xff]  ;;  %v83_v8 = vld [vmem:[%s2981_s0] sm:$0xff] }
   0xf   :  { %107 = vmatpush.msra.mxu1 %v61_v2  ;;  %v2542_v9 = vld [vmem:[#allocation5 + $0x60] sm:$0xff]  ;;  %v65_v10 = vld [vmem:[#allocation5 + $0x50] sm:$0xff]  ;;  %v66_v11 = vld [vmem:[#allocation5 + $0x58] sm:$0xff] }
  0x10   :  { %185 = vmatpush.msra.mxu3 %v2533_v4  ;;  %v2545_v12 = vld [vmem:[#allocation5 + $0xb0] sm:$0xff]  ;;  %152 = vmatpush.msra.mxu2 %v66_v11  ;;  %v63_v13 = vld [vmem:[#allocation5 + $0x40] sm:$0xff]  ;;  %v62_v14 = vld [vmem:[#allocation5 + $0x38] sm:$0xff] }
  0x11   :  { %108 = vmatpush.msra.mxu1 %v58_v5  ;;  %v2549_v15 = vld [vmem:[#allocation5 + $0xb8] sm:$0xff]  ;;  %v60_v17 = vld [vmem:[#allocation5 + $0x28] sm:$0xff]  ;;  %v59_v18 = vld [vmem:[#allocation5 + $0x20] sm:$0xff] }
  0x12   :  { %186 = vmatpush.msra.mxu3 %v2536_v6  ;;  %v2552_v16 = vld [vmem:[#allocation5 + $0x98] sm:$0xff]  ;;  %153 = vmatpush.msra.mxu2 %v63_v13  ;;  %v2555_v19 = vld [vmem:[#allocation5 + $0xa0] sm:$0xff]  ;;  %v57_v21 = vld [vmem:[#allocation5 + $0x10] sm:$0xff] }
  0x13   :  { %109 = vmatpush.msra.mxu1 %v55_v7  ;;  %v2557_v20 = vld [vmem:[#allocation5 + $0x80] sm:$0xff]  ;;  %224 = vmatpush.msra.mxu0 %v2549_v15  ;;  %v56_v22 = vld [vmem:[#allocation5 + $0x8] sm:$0xff]  ;;  %v84_v23 = vld [vmem:[%s2981_s0 + $0x8] sm:$0xff] }
  0x14   :  { %2193 = vmatmul.msk.f32.vlgmr.msra.gmra.mxu1 %vm52_vm0, %v83_v8  ;;  %187 = vmatpush.msra.mxu3 %v2542_v9  ;;  %v2564_v24 = vld [vmem:[#allocation5 + $0x68] sm:$0xff]  ;;  %v2573_v26 = vld [vmem:[#allocation5 + $0x70] sm:$0xff]  ;;  %v79_v27 = vld [vmem:[#allocation5 + $0xc0] sm:$0x3] }
  0x15   :  { %129 = vmatpush.msrb.mxu1 %v65_v10  ;;  %188 = vmatmul.f32.vlgmr.msra.gmra.mxu3 %v2495_v0  ;;  %v2568_v25 = vld [vmem:[#allocation5 + $0x88] sm:$0xff]  ;;  %v85_v28 = vperm.slane %v79_v27, 0  ;;  %v81_v31 = vld [vmem:[#allocation5 + $0xd0] sm:$0x3] }
  0x16   :  { %204 = vmatpush.msrb.mxu3 %v2545_v12  ;;  %154 = vmatpush.msra.mxu2 %v60_v17  ;;  %v80_v36 = vld [vmem:[#allocation5 + $0xc8] sm:$0x3]  ;;  %v87_v37 = vperm.slane %v81_v31, 0  ;;  %v2614_v60 = vperm.slane %v81_v31, 1 }
  0x17   :  { %130 = vmatpush.msrb.mxu1 %v62_v14  ;;  %225 = vmatpush.msra.mxu0 %v2555_v19  ;;  %v86_v40 = vperm.slane %v80_v36, 0 }
  0x18   :  { %205 = vmatpush.msrb.mxu3 %v2552_v16  ;;  %155 = vmatpush.msra.mxu2 %v57_v21 }
  0x19   :  { %131 = vmatpush.msrb.mxu1 %v59_v18  ;;  %2197 = vmatmul.msk.f32.vlgmr.msra.gmra.mxu2 %vm52_vm0, %v83_v8 }
  0x1a   :  { %206 = vmatpush.msrb.mxu3 %v2557_v20  ;;  %226 = vmatpush.msra.mxu0 %v2568_v25 }
  0x1b   :  { %132 = vmatpush.msrb.mxu1 %v56_v22  ;;  %320 = vmatpush.msrb.mxu2 %v2545_v12 }
  0x1c   :  { %2194 = vmatmul.msk.f32.gmra.mxu1 %vm52_vm0, %v84_v23  ;;  %207 = vmatpush.msrb.mxu3 %v2564_v24 }
  0x1d   :  { %208 = vmatmul.f32.vlgmr.msrb.gmra.mxu3 %v2495_v0  ;;  %300 = vmatpush.msra.mxu1 %v2531_v3 }
  0x1e   :  { %227 = vmatpush.msra.mxu0 %v2573_v26  ;;  %340 = vmatpush.msra.mxu3 %v2549_v15 }
  0x1f   :  { %228 = vmatmul.f32.vlgmr.msra.gmra.mxu0 %v2495_v0  ;;  %301 = vmatpush.msra.mxu1 %v2533_v4 }
  0x20   :  { %321 = vmatpush.msrb.mxu2 %v2552_v16  ;;  %341 = vmatpush.msra.mxu3 %v2555_v19 }
  0x21   :  { %302 = vmatpush.msra.mxu1 %v2536_v6  ;;  %428 = vmatpush.msrb.mxu0 %v2531_v3 }
  0x22   :  { %2198 = vmatmul.msk.f32.gmra.mxu2 %vm52_vm0, %v84_v23  ;;  %342 = vmatpush.msra.mxu3 %v2568_v25 }
  0x23   :  { %322 = vmatpush.msrb.mxu2 %v2557_v20  ;;  %303 = vmatpush.msra.mxu1 %v2542_v9 }
  0x24   :  { %2195 = vmatmul.msk.f32.vlgmr.msrb.gmra.mxu1 %vm52_vm0, %v83_v8  ;;  %343 = vmatpush.msra.mxu3 %v2573_v26 }
  0x25   :  { %323 = vmatpush.msrb.mxu2 %v2564_v24  ;;  %448 = vmatpush.msrb.mxu1 %v2545_v12 }
  0x26   :  { %429 = vmatpush.msrb.mxu0 %v2533_v4  ;;  %556 = vmatpush.msrb.mxu3 %v2531_v3 }
  0x27   :  { %468 = vmatpush.msra.mxu2 %v2549_v15  ;;  %449 = vmatpush.msrb.mxu1 %v2552_v16 }
  0x28   :  { %430 = vmatpush.msrb.mxu0 %v2536_v6  ;;  %557 = vmatpush.msrb.mxu3 %v2533_v4 }
  0x29   :  { %469 = vmatpush.msra.mxu2 %v2555_v19  ;;  %450 = vmatpush.msrb.mxu1 %v2557_v20 }
  0x2a   :  { %431 = vmatpush.msrb.mxu0 %v2542_v9  ;;  %558 = vmatpush.msrb.mxu3 %v2536_v6 }
  0x2b   :  { %470 = vmatpush.msra.mxu2 %v2568_v25  ;;  %451 = vmatpush.msrb.mxu1 %v2564_v24 }
  0x2c   :  { %2196 = vmatmul.msk.f32.gmra.mxu1 %vm52_vm0, %v84_v23  ;;  %576 = vmatpush.msra.mxu0 %v2545_v12 }
  0x2d   :  { %471 = vmatpush.msra.mxu2 %v2573_v26  ;;  %559 = vmatpush.msrb.mxu3 %v2542_v9 }
  0x2e   :  { %577 = vmatpush.msra.mxu0 %v2552_v16 }
  0x30   :  { %578 = vmatpush.msra.mxu0 %v2557_v20 }
  0x32   :  { %579 = vmatpush.msra.mxu0 %v2564_v24 }
  0x91   :  { %v111_v29 = vpop.f32.mrf.mxu1 }
  0x92   :  { %v112_v30 = vadd.f32 %v111_v29, %v85_v28 }
  0x94   :  { %163 = vst [vmem:[#allocation2 + $0x28] sm:$0xff] %v112_v30 }
  0x98   :  { %v189_v33 = vpop.f32.mrf.mxu3 }
  0x99   :  { %v114_v32 = vpop.f32.mrf.mxu1 }
  0x9a   :  { %v115_v34 = vadd.f32 %v114_v32, %v85_v28 }
  0x9b   :  { %v232_v35 = vld [vmem:[#allocation2 + $0x28] sm:$0x3] }
  0x9c   :  { %166 = vst [vmem:[#allocation2] sm:$0xff] %v115_v34  ;;  %v235_v38 = vadd.f32 %v232_v35, %v189_v33  ;;  %v157_v41 = vpop.f32.mrf.mxu2  ;;  %v229_v63 = vpop.f32.mrf.mxu0 }
  0x9d   :  { %v158_v42 = vadd.f32 %v157_v41, %v87_v37  ;;  %v275_v8 = vadd.f32 %v229_v63, %v2614_v60 }
  0x9e   :  { %v2199_v39 = vmul.f32 -1.442695, %v235_v38 }
  0x9f   :  { %165 = vst [vmem:[#allocation2 + $0x8] sm:$0xff] %v158_v42 }
  0xa0   :  { %2285 = vpow2.f32 %v2199_v39  ;;  %v209_v47 = vpop.f32.mrf.mxu3  ;;  %v348_v39 = vld [vmem:[#allocation2 + $0x28] sm:$0xc] }
  0xa1   :  { %v134_v43 = vpop.f32.mrf.mxu1 }
  0xa2   :  { %v135_v44 = vadd.f32 %v134_v43, %v86_v40 }
  0xa4   :  { %164 = vst [vmem:[#allocation2 + $0x10] sm:$0xff] %v135_v44 }
  0xa5   :  { %v160_v54 = vpop.f32.mrf.mxu2 }
  0xa6   :  { %v2286_v45 = vpop.eup %2285  ;;  %v161_v57 = vadd.f32 %v160_v54, %v87_v37  ;;  %v234_v13 = vld [vmem:[#allocation2 + $0x8] sm:$0x3] }
  0xa7   :  { %v239_v46 = vadd.f32 1.0, %v2286_v45 }
  0xa8   :  { %168 = vst [vmem:[#allocation2 + $0x20] sm:$0xff] %v161_v57 }
  0xa9   :  { %2287 = vrcp.f32 %v239_v46  ;;  %v137_v53 = vpop.f32.mrf.mxu1  ;;  %v251_v59 = vand.u32 2147483648, %v239_v46  ;;  %v249_v61 = vand.u32 2147483647, %v239_v46  ;;  %vm245_vm2 = vweird.f32 %v239_v46 }
  0xaa   :  { %v138_v56 = vadd.f32 %v137_v53, %v86_v40 }
  0xab   :  { %v233_v48 = vld [vmem:[#allocation2 + $0x10] sm:$0x3]  ;;  %v252_v7 = vor.u32 1.1754944e-38, %v251_v59  ;;  %vm250_vm4 = vcmp.eq.f32.partialorder %v249_v61, 8.507059e+37  ;;  %v349_v44 = vld [vmem:[#allocation2 + $0x10] sm:$0xc] }
  0xac   :  { %v255_v49 = vadd.f32 %v233_v48, %v209_v47  ;;  %167 = vst [vmem:[#allocation2 + $0x18] sm:$0xff] %v138_v56 }
  0xae   :  { %v2200_v50 = vmul.f32 -1.442695, %v255_v49 }
  0xaf   :  { %v2288_v51 = vpop.eup %2287 }
  0xb0   :  { %2289 = vpow2.f32 %v2200_v50  ;;  %v241_v52 = vmul.f32 %v2288_v51, %v239_v46  ;;  %vm246_vm1 = vweird.f32 %v2288_v51 }
  0xb1   :  { %vm247_vm3 = vmor %vm245_vm2, %vm246_vm1 }
  0xb2   :  { %v242_v55 = vsub.f32 1.0, %v241_v52 }
  0xb4   :  { %v243_v58 = vmul.f32 %v2288_v51, %v242_v55 }
  0xb6   :  { %v2290_v62 = vpop.eup %2289  ;;  %v244_v1 = vadd.f32 %v2288_v51, %v243_v58 }
  0xb7   :  { %v259_v2 = vadd.f32 1.0, %v2290_v62 }
  0xb8   :  { %v248_v5 = vsel %vm247_vm3, %v2288_v51, %v244_v1  ;;  %vm410_vm3 = vcmask 257026  }
  0xb9   :  { %2291 = vrcp.f32 %v259_v2  ;;  %v253_v10 = vsel %vm250_vm4, %v252_v7, %v248_v5  ;;  %v271_v22 = vand.u32 2147483648, %v259_v2  ;;  %v269_v27 = vand.u32 2147483647, %v259_v2 }
  0xba   :  { %v276_v11 = vmul.f32 %v275_v8, %v253_v10  ;;  %vm265_vm6 = vweird.f32 %v259_v2 }
  0xbb   :  { %v272_v29 = vor.u32 1.1754944e-38, %v271_v22  ;;  %vm270_vm8 = vcmp.eq.f32.partialorder %v269_v27, 8.507059e+37 }
  0xbc   :  { %v277_v18 = vadd.f32 %v276_v11, %v234_v13 }
  0xbe   :  { %2293 = vtanh.f32 %v277_v18 }
  0xbf   :  { %v2292_v14 = vpop.eup %2291 }
  0xc0   :  { %v261_v17 = vmul.f32 %v2292_v14, %v259_v2  ;;  %vm266_vm5 = vweird.f32 %v2292_v14 }
  0xc1   :  { %vm267_vm7 = vmor %vm265_vm6, %vm266_vm5 }
  0xc2   :  { %v262_v21 = vsub.f32 1.0, %v261_v17 }
  0xc4   :  { %v263_v23 = vmul.f32 %v2292_v14, %v262_v21  ;;  %v2294_v33 = vpop.eup %2293 }
  0xc6   :  { %v264_v28 = vadd.f32 %v2292_v14, %v263_v23 }
  0xc8   :  { %v268_v30 = vsel %vm267_vm7, %v2292_v14, %v264_v28  ;;  %v350_v14 = vld [vmem:[#allocation2 + $0x8] sm:$0xc] }
  0xc9   :  { %v273_v31 = vsel %vm270_vm8, %v272_v29, %v268_v30 }
  0xca   :  { %v279_v32 = vsub.f32 1.0, %v273_v31  ;;  %v281_v35 = vmul.f32 0.0, %v273_v31 }
  0xcc   :  { %v280_v34 = vmul.f32 %v2294_v33, %v279_v32 }
  0xce   :  { %v2617_v36 = vadd.f32 %v281_v35, %v280_v34 }
  0xd0   :  { %2201 = vmatmul.msk.f32.vlgmr.msra.gmra.mxu1 %vm52_vm0, %v2617_v36  ;;  %2202 = vmatmul.msk.f32.vlgmr.msrb.gmra.mxu2 %vm52_vm0, %v2617_v36  ;;  %284 = vst.msk [vmem:[#allocation3] sm:$0x3] %vm283_vm9, %v2617_v36  ;;  %v406_v28 = vrot.slane %v2617_v36, 6 }
  0xd1   :  { %2203 = vmatmul.msk.f32.vlgmr.msra.gmra.mxu3 %vm52_vm0, %v2617_v36  ;;  %596 = vmatpush.msra.mxu1 %v2549_v15 }
  0xd2   :  { %684 = vmatpush.msrb.mxu2 %v2531_v3  ;;  %704 = vmatpush.msra.mxu3 %v2545_v12 }
  0xd3   :  { %597 = vmatpush.msra.mxu1 %v2555_v19 }
  0xd4   :  { %685 = vmatpush.msrb.mxu2 %v2533_v4  ;;  %705 = vmatpush.msra.mxu3 %v2552_v16 }
  0xd5   :  { %598 = vmatpush.msra.mxu1 %v2568_v25 }
  0xd6   :  { %686 = vmatpush.msrb.mxu2 %v2536_v6  ;;  %706 = vmatpush.msra.mxu3 %v2557_v20 }
  0xd7   :  { %599 = vmatpush.msra.mxu1 %v2573_v26 }
  0xd8   :  { %687 = vmatpush.msrb.mxu2 %v2542_v9  ;;  %707 = vmatpush.msra.mxu3 %v2564_v24 }
 0x14d   :  { %v305_v37 = vpop.f32.mrf.mxu1 }
 0x14e   :  { %v352_v38 = vrot.slane %v305_v37, 6 }
 0x150   :  { %v354_v40 = vadd.f32 %v352_v38, %v348_v39  ;;  %v476_v38 = vld [vmem:[#allocation2 + $0x28] sm:$0x30]  ;;  %v477_v39 = vld [vmem:[#allocation2 + $0x10] sm:$0x30] }
 0x152   :  { %v2204_v41 = vmul.f32 -1.442695, %v354_v40 }
 0x153   :  { %v325_v42 = vpop.f32.mrf.mxu2 }
 0x154   :  { %2295 = vpow2.f32 %v2204_v41  ;;  %v375_v43 = vrot.slane %v325_v42, 6  ;;  %v345_v53 = vpop.f32.mrf.mxu3 }
 0x155   :  { %v397_v58 = vadd.f32 %v345_v53, %v2614_v60 }
 0x156   :  { %v377_v45 = vadd.f32 %v375_v43, %v349_v44 }
 0x157   :  { %v399_v5 = vrot.slane %v397_v58, 6 }
 0x158   :  { %v2205_v46 = vmul.f32 -1.442695, %v377_v45 }
 0x15a   :  { %v2296_v47 = vpop.eup %2295  ;;  %2297 = vpow2.f32 %v2205_v46 }
 0x15b   :  { %v358_v48 = vadd.f32 1.0, %v2296_v47 }
 0x15d   :  { %2299 = vrcp.f32 %v358_v48  ;;  %v370_v55 = vand.u32 2147483648, %v358_v48  ;;  %v368_v57 = vand.u32 2147483647, %v358_v48  ;;  %vm364_vm11 = vweird.f32 %v358_v48 }
 0x15f   :  { %v371_v63 = vor.u32 1.1754944e-38, %v370_v55  ;;  %vm369_vm13 = vcmp.eq.f32.partialorder %v368_v57, 8.507059e+37 }
 0x160   :  { %v2298_v49 = vpop.eup %2297 }
 0x161   :  { %v381_v50 = vadd.f32 1.0, %v2298_v49 }
 0x163   :  { %v2300_v51 = vpop.eup %2299  ;;  %2301 = vrcp.f32 %v381_v50  ;;  %v393_v10 = vand.u32 2147483648, %v381_v50  ;;  %v391_v13 = vand.u32 2147483647, %v381_v50  ;;  %vm387_vm15 = vweird.f32 %v381_v50 }
 0x164   :  { %v360_v52 = vmul.f32 %v2300_v51, %v358_v48  ;;  %vm365_vm10 = vweird.f32 %v2300_v51 }
 0x165   :  { %vm366_vm12 = vmor %vm364_vm11, %vm365_vm10  ;;  %v394_v21 = vor.u32 1.1754944e-38, %v393_v10  ;;  %vm392_vm2 = vcmp.eq.f32.partialorder %v391_v13, 8.507059e+37 }
 0x166   :  { %v361_v54 = vsub.f32 1.0, %v360_v52 }
 0x168   :  { %v362_v56 = vmul.f32 %v2300_v51, %v361_v54 }
 0x169   :  { %v2302_v59 = vpop.eup %2301 }
 0x16a   :  { %v383_v61 = vmul.f32 %v2302_v59, %v381_v50  ;;  %v363_v62 = vadd.f32 %v2300_v51, %v362_v56  ;;  %vm388_vm14 = vweird.f32 %v2302_v59 }
 0x16b   :  { %vm389_vm1 = vmor %vm387_vm15, %vm388_vm14 }
 0x16c   :  { %v384_v1 = vsub.f32 1.0, %v383_v61  ;;  %v367_v2 = vsel %vm366_vm12, %v2300_v51, %v363_v62 }
 0x16d   :  { %v372_v7 = vsel %vm369_vm13, %v371_v63, %v367_v2  ;;  %vm538_vm13 = vcmask 259076  }
 0x16e   :  { %v385_v8 = vmul.f32 %v2302_v59, %v384_v1  ;;  %v401_v11 = vmul.f32 %v399_v5, %v372_v7 }
 0x170   :  { %v386_v17 = vadd.f32 %v2302_v59, %v385_v8  ;;  %v402_v18 = vadd.f32 %v401_v11, %v350_v14  ;;  %v478_v11 = vld [vmem:[#allocation2 + $0x8] sm:$0x30] }
 0x172   :  { %v390_v22 = vsel %vm389_vm1, %v2302_v59, %v386_v17  ;;  %2303 = vtanh.f32 %v402_v18 }
 0x173   :  { %v395_v23 = vsel %vm392_vm2, %v394_v21, %v390_v22 }
 0x174   :  { %v404_v27 = vsub.f32 1.0, %v395_v23  ;;  %v408_v31 = vmul.f32 %v406_v28, %v395_v23 }
 0x178   :  { %v2304_v29 = vpop.eup %2303 }
 0x179   :  { %v405_v30 = vmul.f32 %v2304_v29, %v404_v27 }
 0x17b   :  { %v2641_v32 = vadd.f32 %v408_v31, %v405_v30  ;;  %v605_v31 = vld [vmem:[#allocation2 + $0x10] sm:$0xc0] }
 0x17d   :  { %411 = vst.msk [vmem:[#allocation3] sm:$0xc] %vm410_vm3, %v2641_v32  ;;  %v413_v33 = vrot.slane %v2641_v32, 2  ;;  %v534_v21 = vrot.slane %v2641_v32, 6 }
 0x17f   :  { %2206 = vmatmul.msk.f32.vlgmr.msrb.gmra.mxu0 %vm52_vm0, %v413_v33  ;;  %2207 = vmatmul.msk.f32.vlgmr.msrb.gmra.mxu1 %vm52_vm0, %v413_v33 }
 0x180   :  { %2208 = vmatmul.msk.f32.vlgmr.msra.gmra.mxu2 %vm52_vm0, %v413_v33  ;;  %724 = vmatpush.msrb.mxu0 %v2549_v15 }
 0x181   :  { %800 = vmatpush.msrb.mxu1 %v2531_v3  ;;  %820 = vmatpush.msra.mxu2 %v2545_v12 }
 0x182   :  { %725 = vmatpush.msrb.mxu0 %v2555_v19 }
 0x183   :  { %801 = vmatpush.msrb.mxu1 %v2533_v4  ;;  %821 = vmatpush.msra.mxu2 %v2552_v16 }
 0x184   :  { %726 = vmatpush.msrb.mxu0 %v2568_v25 }
 0x185   :  { %802 = vmatpush.msrb.mxu1 %v2536_v6  ;;  %822 = vmatpush.msra.mxu2 %v2557_v20 }
 0x186   :  { %727 = vmatpush.msrb.mxu0 %v2573_v26 }
 0x187   :  { %803 = vmatpush.msrb.mxu1 %v2542_v9  ;;  %823 = vmatpush.msra.mxu2 %v2564_v24 }
 0x1fc   :  { %v433_v34 = vpop.f32.mrf.mxu0  ;;  %v453_v35 = vpop.f32.mrf.mxu1 }
 0x1fd   :  { %v480_v36 = vrot.slane %v433_v34, 4  ;;  %v503_v37 = vrot.slane %v453_v35, 4  ;;  %v604_v34 = vld [vmem:[#allocation2 + $0x28] sm:$0xc0] }
 0x1ff   :  { %v482_v40 = vadd.f32 %v480_v36, %v476_v38  ;;  %v505_v41 = vadd.f32 %v503_v37, %v477_v39 }
 0x201   :  { %v2209_v42 = vmul.f32 -1.442695, %v482_v40  ;;  %v2210_v43 = vmul.f32 -1.442695, %v505_v41 }
 0x203   :  { %2305 = vpow2.f32 %v2209_v42  ;;  %v473_v52 = vpop.f32.mrf.mxu2 }
 0x204   :  { %2307 = vpow2.f32 %v2210_v43  ;;  %v525_v58 = vadd.f32 %v473_v52, %v2614_v60 }
 0x206   :  { %v527_v1 = vrot.slane %v525_v58, 4  ;;  %v606_v58 = vld [vmem:[#allocation2 + $0x8] sm:$0xc0] }
 0x209   :  { %v2306_v44 = vpop.eup %2305 }
 0x20a   :  { %v2308_v45 = vpop.eup %2307  ;;  %v486_v46 = vadd.f32 1.0, %v2306_v44 }
 0x20b   :  { %v509_v47 = vadd.f32 1.0, %v2308_v45 }
 0x20c   :  { %2309 = vrcp.f32 %v486_v46  ;;  %v498_v55 = vand.u32 2147483648, %v486_v46  ;;  %v496_v57 = vand.u32 2147483647, %v486_v46  ;;  %vm492_vm5 = vweird.f32 %v486_v46 }
 0x20d   :  { %2311 = vrcp.f32 %v509_v47  ;;  %v521_v7 = vand.u32 2147483648, %v509_v47  ;;  %vm515_vm10 = vweird.f32 %v509_v47  ;;  %v519_v10 = vand.u32 2147483647, %v509_v47 }
 0x20e   :  { %v499_v62 = vor.u32 1.1754944e-38, %v498_v55  ;;  %vm497_vm7 = vcmp.eq.f32.partialorder %v496_v57, 8.507059e+37 }
 0x20f   :  { %v522_v17 = vor.u32 1.1754944e-38, %v521_v7  ;;  %vm520_vm12 = vcmp.eq.f32.partialorder %v519_v10, 8.507059e+37 }
 0x212   :  { %v2310_v48 = vpop.eup %2309 }
 0x213   :  { %v2312_v49 = vpop.eup %2311  ;;  %v488_v50 = vmul.f32 %v2310_v48, %v486_v46  ;;  %vm493_vm4 = vweird.f32 %v2310_v48 }
 0x214   :  { %v511_v51 = vmul.f32 %v2312_v49, %v509_v47  ;;  %vm494_vm6 = vmor %vm492_vm5, %vm493_vm4  ;;  %vm516_vm8 = vweird.f32 %v2312_v49 }
 0x215   :  { %v489_v53 = vsub.f32 1.0, %v488_v50  ;;  %vm517_vm11 = vmor %vm515_vm10, %vm516_vm8  ;;  %vm666_vm8 = vcmask 261126  }
 0x216   :  { %v512_v54 = vsub.f32 1.0, %v511_v51 }
 0x217   :  { %v490_v56 = vmul.f32 %v2310_v48, %v489_v53 }
 0x218   :  { %v513_v59 = vmul.f32 %v2312_v49, %v512_v54 }
 0x219   :  { %v491_v61 = vadd.f32 %v2310_v48, %v490_v56 }
 0x21a   :  { %v514_v5 = vadd.f32 %v2312_v49, %v513_v59 }
 0x21b   :  { %v495_v63 = vsel %vm494_vm6, %v2310_v48, %v491_v61 }
 0x21c   :  { %v500_v2 = vsel %vm497_vm7, %v499_v62, %v495_v63  ;;  %v518_v14 = vsel %vm517_vm11, %v2312_v49, %v514_v5 }
 0x21d   :  { %v529_v8 = vmul.f32 %v527_v1, %v500_v2  ;;  %v523_v18 = vsel %vm520_vm12, %v522_v17, %v518_v14  ;;  %v732_v14 = vld [vmem:[#allocation2] sm:$0x3] }
 0x21e   :  { %v532_v22 = vsub.f32 1.0, %v523_v18  ;;  %v536_v28 = vmul.f32 %v534_v21, %v523_v18  ;;  %v733_v18 = vld [vmem:[#allocation2 + $0x18] sm:$0x3] }
 0x21f   :  { %v530_v13 = vadd.f32 %v529_v8, %v478_v11 }
 0x221   :  { %2313 = vtanh.f32 %v530_v13 }
 0x227   :  { %v2314_v23 = vpop.eup %2313 }
 0x228   :  { %v533_v27 = vmul.f32 %v2314_v23, %v532_v22 }
 0x22a   :  { %v2663_v29 = vadd.f32 %v536_v28, %v533_v27 }
 0x22c   :  { %539 = vst.msk [vmem:[#allocation3] sm:$0x30] %vm538_vm13, %v2663_v29  ;;  %v541_v30 = vrot.slane %v2663_v29, 4  ;;  %v662_v2 = vrot.slane %v2663_v29, 6 }
 0x22e   :  { %2211 = vmatmul.msk.f32.vlgmr.msrb.gmra.mxu3 %vm52_vm0, %v541_v30  ;;  %2212 = vmatmul.msk.f32.vlgmr.msra.gmra.mxu0 %vm52_vm0, %v541_v30 }
 0x22f   :  { %2213 = vmatmul.msk.f32.vlgmr.msra.gmra.mxu1 %vm52_vm0, %v541_v30  ;;  %840 = vmatpush.msrb.mxu3 %v2549_v15 }
 0x230   :  { %927 = vmatpush.msra.mxu0 %v2531_v3  ;;  %947 = vmatpush.msra.mxu1 %v2545_v12 }
 0x231   :  { %841 = vmatpush.msrb.mxu3 %v2555_v19 }
 0x232   :  { %928 = vmatpush.msra.mxu0 %v2533_v4  ;;  %948 = vmatpush.msra.mxu1 %v2552_v16 }
 0x233   :  { %842 = vmatpush.msrb.mxu3 %v2568_v25 }
 0x234   :  { %929 = vmatpush.msra.mxu0 %v2536_v6  ;;  %949 = vmatpush.msra.mxu1 %v2557_v20 }
 0x235   :  { %843 = vmatpush.msrb.mxu3 %v2573_v26 }
 0x236   :  { %930 = vmatpush.msra.mxu0 %v2542_v9  ;;  %950 = vmatpush.msra.mxu1 %v2564_v24 }
 0x2ab   :  { %v581_v3 = vpop.f32.mrf.mxu0 }
 0x2ac   :  { %v631_v12 = vrot.slane %v581_v3, 2  ;;  %v601_v42 = vpop.f32.mrf.mxu1  ;;  %v1038_v3 = vld [vmem:[#allocation5 + $0xd8] sm:$0xff] }
 0x2ad   :  { %v653_v45 = vadd.f32 %v601_v42, %v2614_v60 }
 0x2ae   :  { %v633_v32 = vadd.f32 %v631_v12, %v605_v31 }
 0x2af   :  { %v655_v51 = vrot.slane %v653_v45, 2 }
 0x2b0   :  { %v2215_v33 = vmul.f32 -1.442695, %v633_v32 }
 0x2b1   :  { %v561_v4 = vpop.f32.mrf.mxu3 }
 0x2b2   :  { %2315 = vpow2.f32 %v2215_v33  ;;  %v608_v16 = vrot.slane %v561_v4, 2 }
 0x2b4   :  { %v610_v35 = vadd.f32 %v608_v16, %v604_v34 }
 0x2b6   :  { %v2214_v36 = vmul.f32 -1.442695, %v610_v35 }
 0x2b8   :  { %v2316_v6 = vpop.eup %2315  ;;  %2317 = vpow2.f32 %v2214_v36 }
 0x2b9   :  { %v637_v20 = vadd.f32 1.0, %v2316_v6 }
 0x2bb   :  { %2319 = vrcp.f32 %v637_v20  ;;  %v649_v55 = vand.u32 2147483648, %v637_v20  ;;  %vm643_vm5 = vweird.f32 %v637_v20  ;;  %v647_v57 = vand.u32 2147483647, %v637_v20 }
 0x2bd   :  { %v650_v62 = vor.u32 1.1754944e-38, %v649_v55  ;;  %vm648_vm7 = vcmp.eq.f32.partialorder %v647_v57, 8.507059e+37  ;;  %v848_v57 = vld [vmem:[#allocation2] sm:$0xc] }
 0x2be   :  { %v2318_v37 = vpop.eup %2317 }
 0x2bf   :  { %v614_v38 = vadd.f32 1.0, %v2318_v37 }
 0x2c1   :  { %2321 = vrcp.f32 %v614_v38  ;;  %v2320_v9 = vpop.eup %2319  ;;  %v626_v44 = vand.u32 2147483648, %v614_v38  ;;  %v624_v47 = vand.u32 2147483647, %v614_v38  ;;  %vm620_vm15 = vweird.f32 %v614_v38 }
 0x2c2   :  { %v639_v24 = vmul.f32 %v2320_v9, %v637_v20  ;;  %vm644_vm4 = vweird.f32 %v2320_v9 }
 0x2c3   :  { %v627_v50 = vor.u32 1.1754944e-38, %v626_v44  ;;  %vm625_vm2 = vcmp.eq.f32.partialorder %v624_v47, 8.507059e+37  ;;  %vm645_vm6 = vmor %vm643_vm5, %vm644_vm4  ;;  %v734_v44 = vld [vmem:[#allocation2 + $0x20] sm:$0x3] }
 0x2c4   :  { %v640_v41 = vsub.f32 1.0, %v639_v24 }
 0x2c6   :  { %v641_v48 = vmul.f32 %v2320_v9, %v640_v41 }
 0x2c7   :  { %v2322_v39 = vpop.eup %2321 }
 0x2c8   :  { %v616_v40 = vmul.f32 %v2322_v39, %v614_v38  ;;  %vm621_vm14 = vweird.f32 %v2322_v39  ;;  %v642_v53 = vadd.f32 %v2320_v9, %v641_v48 }
 0x2c9   :  { %vm622_vm1 = vmor %vm620_vm15, %vm621_vm14 }
 0x2ca   :  { %v617_v43 = vsub.f32 1.0, %v616_v40  ;;  %v646_v61 = vsel %vm645_vm6, %v2320_v9, %v642_v53 }
 0x2cb   :  { %v651_v63 = vsel %vm648_vm7, %v650_v62, %v646_v61 }
 0x2cc   :  { %v618_v46 = vmul.f32 %v2322_v39, %v617_v43  ;;  %v660_v1 = vsub.f32 1.0, %v651_v63  ;;  %v664_v8 = vmul.f32 %v662_v2, %v651_v63 }
 0x2ce   :  { %v619_v49 = vadd.f32 %v2322_v39, %v618_v46 }
 0x2d0   :  { %v623_v52 = vsel %vm622_vm1, %v2322_v39, %v619_v49 }
 0x2d1   :  { %v628_v54 = vsel %vm625_vm2, %v627_v50, %v623_v52 }
 0x2d2   :  { %v657_v56 = vmul.f32 %v655_v51, %v628_v54 }
 0x2d4   :  { %v658_v59 = vadd.f32 %v657_v56, %v606_v58 }
 0x2d6   :  { %2323 = vtanh.f32 %v658_v59 }
 0x2dc   :  { %v2324_v5 = vpop.eup %2323 }
 0x2dd   :  { %v661_v7 = vmul.f32 %v2324_v5, %v660_v1  ;;  %v849_v1 = vld [vmem:[#allocation2 + $0x18] sm:$0xc]  ;;  %v2714_v5 = vld [vmem:[#allocation5 + $0x198] sm:$0x3] }
 0x2df   :  { %v665_v10 = vadd.f32 %v664_v8, %v661_v7 }
 0x2e1   :  { %667 = vst.msk [vmem:[#allocation3] sm:$0xc0] %vm666_vm8, %v665_v10  ;;  %v2686_v11 = vrot.slane %v665_v10, 6  ;;  %v1068_v10 = vperm.slane %v2714_v5, 0 }
 0x2e3   :  { %2216 = vmatmul.msk.f32.vlgmr.msrb.gmra.mxu2 %vm52_vm0, %v2686_v11  ;;  %2217 = vmatmul.msk.f32.vlgmr.msra.gmra.mxu3 %vm52_vm0, %v2686_v11 }
 0x2e4   :  { %2218 = vmatmul.msk.f32.vlgmr.msrb.gmra.mxu0 %vm52_vm0, %v2686_v11  ;;  %967 = vmatpush.msrb.mxu2 %v2549_v15 }
 0x2e6   :  { %968 = vmatpush.msrb.mxu2 %v2555_v19  ;;  %v1047_v19 = vld [vmem:[#allocation5 + $0x120] sm:$0xff] }
 0x2e7   :  { %1089 = vmatpush.msra.mxu3 %v1047_v19 }
 0x2e8   :  { %969 = vmatpush.msrb.mxu2 %v2568_v25  ;;  %v1044_v25 = vld [vmem:[#allocation5 + $0x108] sm:$0xff]  ;;  %v2710_v54 = vld [vmem:[#allocation3] sm:$0xff] }
 0x2e9   :  { %1090 = vmatpush.msra.mxu3 %v1044_v25  ;;  %v2724_v25 = vld [vmem:[#allocation5 + $0x150] sm:$0xff] }
 0x2ea   :  { %970 = vmatpush.msrb.mxu2 %v2573_v26  ;;  %v1041_v26 = vld [vmem:[#allocation5 + $0xf0] sm:$0xff] }
 0x2eb   :  { %1091 = vmatpush.msra.mxu3 %v1041_v26 }
 0x2ed   :  { %1092 = vmatpush.msra.mxu3 %v1038_v3  ;;  %v1039_v3 = vld [vmem:[#allocation5 + $0xe0] sm:$0xff] }
 0x361   :  { %v729_v6 = vpop.f32.mrf.mxu0 }
 0x362   :  { %v775_v9 = vadd.f32 %v729_v6, %v2614_v60 }
 0x366   :  { %v689_v13 = vpop.f32.mrf.mxu2  ;;  %v709_v17 = vpop.f32.mrf.mxu3 }
 0x367   :  { %v735_v21 = vadd.f32 %v732_v14, %v689_v13  ;;  %v755_v22 = vadd.f32 %v733_v18, %v709_v17  ;;  %v1048_v18 = vld [vmem:[#allocation5 + $0x128] sm:$0xff] }
 0x368   :  { %1112 = vmatpush.msrb.mxu0 %v1048_v18 }
 0x369   :  { %v2219_v23 = vmul.f32 -1.442695, %v735_v21  ;;  %v2220_v27 = vmul.f32 -1.442695, %v755_v22  ;;  %v1049_v21 = vld [vmem:[#allocation5 + $0x130] sm:$0xff]  ;;  %v2719_v22 = vld [vmem:[#allocation5 + $0x180] sm:$0xff] }
 0x36b   :  { %2325 = vpow2.f32 %v2219_v23 }
 0x36c   :  { %2327 = vpow2.f32 %v2220_v27  ;;  %v1045_v27 = vld [vmem:[#allocation5 + $0x110] sm:$0xff] }
 0x36d   :  { %1113 = vmatpush.msrb.mxu0 %v1045_v27 }
 0x371   :  { %v2326_v28 = vpop.eup %2325 }
 0x372   :  { %v2328_v29 = vpop.eup %2327  ;;  %v739_v30 = vadd.f32 1.0, %v2326_v28  ;;  %v1046_v28 = vld [vmem:[#allocation5 + $0x118] sm:$0xff] }
 0x373   :  { %v759_v15 = vadd.f32 1.0, %v2328_v29  ;;  %v2721_v29 = vld [vmem:[#allocation5 + $0x168] sm:$0xff] }
 0x374   :  { %2329 = vrcp.f32 %v739_v30  ;;  %v751_v16 = vand.u32 2147483648, %v739_v30  ;;  %v749_v36 = vand.u32 2147483647, %v739_v30  ;;  %vm745_vm11 = vweird.f32 %v739_v30 }
 0x375   :  { %2331 = vrcp.f32 %v759_v15  ;;  %v771_v42 = vand.u32 2147483648, %v759_v15  ;;  %vm765_vm1 = vweird.f32 %v759_v15  ;;  %v769_v43 = vand.u32 2147483647, %v759_v15 }
 0x376   :  { %v752_v38 = vor.u32 1.1754944e-38, %v751_v16  ;;  %vm750_vm14 = vcmp.eq.f32.partialorder %v749_v36, 8.507059e+37 }
 0x377   :  { %v772_v47 = vor.u32 1.1754944e-38, %v771_v42  ;;  %vm770_vm4 = vcmp.eq.f32.partialorder %v769_v43, 8.507059e+37  ;;  %v850_v43 = vld [vmem:[#allocation2 + $0x20] sm:$0xc] }
 0x37a   :  { %v2330_v12 = vpop.eup %2329 }
 0x37b   :  { %v2332_v31 = vpop.eup %2331  ;;  %v741_v32 = vmul.f32 %v2330_v12, %v739_v30  ;;  %vm746_vm10 = vweird.f32 %v2330_v12  ;;  %v1042_v30 = vld [vmem:[#allocation5 + $0xf8] sm:$0xff] }
 0x37c   :  { %v761_v33 = vmul.f32 %v2332_v31, %v759_v15  ;;  %vm747_vm12 = vmor %vm745_vm11, %vm746_vm10  ;;  %vm766_vm15 = vweird.f32 %v2332_v31  ;;  %v1043_v15 = vld [vmem:[#allocation5 + $0x100] sm:$0xff]  ;;  %1114 = vmatpush.msrb.mxu0 %v1042_v30 }
 0x37d   :  { %v742_v4 = vsub.f32 1.0, %v741_v32  ;;  %vm767_vm2 = vmor %vm765_vm1, %vm766_vm15 }
 0x37e   :  { %v762_v34 = vsub.f32 1.0, %v761_v33  ;;  %1115 = vmatpush.msrb.mxu0 %v1039_v3 }
 0x37f   :  { %v743_v35 = vmul.f32 %v2330_v12, %v742_v4 }
 0x380   :  { %v763_v20 = vmul.f32 %v2332_v31, %v762_v34 }
 0x381   :  { %v744_v37 = vadd.f32 %v2330_v12, %v743_v35 }
 0x382   :  { %v764_v40 = vadd.f32 %v2332_v31, %v763_v20 }
 0x383   :  { %v748_v24 = vsel %vm747_vm12, %v2330_v12, %v744_v37  ;;  %v1040_v12 = vld [vmem:[#allocation5 + $0xe8] sm:$0xff] }
 0x384   :  { %v753_v39 = vsel %vm750_vm14, %v752_v38, %v748_v24  ;;  %v768_v46 = vsel %vm767_vm2, %v2332_v31, %v764_v40  ;;  %v2727_v31 = vld [vmem:[#allocation5 + $0x138] sm:$0xff] }
 0x385   :  { %v776_v41 = vmul.f32 %v775_v9, %v753_v39  ;;  %v773_v48 = vsel %vm770_vm4, %v772_v47, %v768_v46 }
 0x386   :  { %v779_v49 = vsub.f32 1.0, %v773_v48  ;;  %v782_v52 = vmul.f32 %v773_v48, %v2686_v11 }
 0x387   :  { %v777_v45 = vadd.f32 %v776_v41, %v734_v44 }
 0x389   :  { %2333 = vtanh.f32 %v777_v45 }
 0x38f   :  { %v2334_v50 = vpop.eup %2333 }
 0x390   :  { %v780_v51 = vmul.f32 %v2334_v50, %v779_v49 }
 0x392   :  { %v2700_v53 = vadd.f32 %v782_v52, %v780_v51 }
 0x394   :  { %784 = vst.msk [vmem:[#allocation3 + $0x8] sm:$0x3] %vm283_vm9, %v2700_v53  ;;  %2221 = vmatmul.msk.f32.vlgmr.msrb.gmra.mxu1 %vm52_vm0, %v2700_v53  ;;  %2222 = vmatmul.msk.f32.vlgmr.msra.gmra.mxu2 %vm52_vm0, %v2700_v53  ;;  %v906_v50 = vrot.slane %v2700_v53, 6 }
 0x395   :  { %2223 = vmatmul.msk.f32.vlgmr.msrb.gmra.mxu3 %vm52_vm0, %v2700_v53  ;;  %1135 = vmatpush.msrb.mxu1 %v1049_v21  ;;  %v2748_v53 = vld [vmem:[#allocation5 + $0x158] sm:$0xff] }
 0x396   :  { %1164 = vmatpush.msra.mxu2 %v2719_v22 }
 0x397   :  { %1136 = vmatpush.msrb.mxu1 %v1046_v28 }
 0x398   :  { %1165 = vmatpush.msra.mxu2 %v2721_v29 }
 0x399   :  { %1137 = vmatpush.msrb.mxu1 %v1043_v15 }
 0x39a   :  { %1166 = vmatpush.msra.mxu2 %v2724_v25 }
 0x39b   :  { %1138 = vmatpush.msrb.mxu1 %v1040_v12 }
 0x39c   :  { %1167 = vmatpush.msra.mxu2 %v2727_v31 }
 0x39d   :  { %2231 = vmatmul.msk.f32.vlgmr.msra.gmra.mxu3 %vm52_vm0, %v2710_v54 }
 0x411   :  { %v805_v55 = vpop.f32.mrf.mxu1 }
 0x412   :  { %v852_v56 = vrot.slane %v805_v55, 6 }
 0x414   :  { %v854_v58 = vadd.f32 %v852_v56, %v848_v57 }
 0x416   :  { %v2224_v59 = vmul.f32 -1.442695, %v854_v58  ;;  %v2738_v58 = vld [vmem:[#allocation5 + $0x188] sm:$0xff] }
 0x417   :  { %v825_v61 = vpop.f32.mrf.mxu2 }
 0x418   :  { %2335 = vpow2.f32 %v2224_v59  ;;  %v875_v62 = vrot.slane %v825_v61, 6  ;;  %v845_v63 = vpop.f32.mrf.mxu3  ;;  %v2743_v59 = vld [vmem:[#allocation5 + $0x170] sm:$0xff]  ;;  %v2756_v61 = vld [vmem:[#allocation5 + $0x140] sm:$0xff] }
 0x419   :  { %v897_v34 = vadd.f32 %v845_v63, %v2614_v60 }
 0x41a   :  { %v877_v2 = vadd.f32 %v875_v62, %v849_v1  ;;  %v975_v1 = vld [vmem:[#allocation2] sm:$0x30] }
 0x41b   :  { %v899_v9 = vrot.slane %v897_v34, 6 }
 0x41c   :  { %v2225_v7 = vmul.f32 -1.442695, %v877_v2 }
 0x41e   :  { %v2336_v8 = vpop.eup %2335  ;;  %2337 = vpow2.f32 %v2225_v7  ;;  %v976_v7 = vld [vmem:[#allocation2 + $0x18] sm:$0x30] }
 0x41f   :  { %v858_v11 = vadd.f32 1.0, %v2336_v8  ;;  %v2771_v8 = vld [vmem:[#allocation5 + $0x1a0] sm:$0x3] }
 0x420   :  { %v1094_v13 = vpop.f32.mrf.mxu3  ;;  %v1069_v21 = vperm.slane %v2771_v8, 0 }
 0x421   :  { %2339 = vrcp.f32 %v858_v11  ;;  %v1095_v14 = vadd.f32 %v1094_v13, %v1068_v10  ;;  %v870_v33 = vand.u32 2147483648, %v858_v11  ;;  %v868_v16 = vand.u32 2147483647, %v858_v11 }
 0x422   :  { %vm864_vm6 = vweird.f32 %v858_v11 }
 0x423   :  { %1146 = vst [vmem:[#allocation2 + $0x28] sm:$0xff] %v1095_v14  ;;  %v871_v20 = vor.u32 1.1754944e-38, %v870_v33  ;;  %vm869_vm10 = vcmp.eq.f32.partialorder %v868_v16, 8.507059e+37  ;;  %v2783_v33 = vld [vmem:[#allocation5 + $0x178] sm:$0xff] }
 0x424   :  { %v2338_v17 = vpop.eup %2337 }
 0x425   :  { %v881_v23 = vadd.f32 1.0, %v2338_v17 }
 0x427   :  { %v2340_v19 = vpop.eup %2339  ;;  %2341 = vrcp.f32 %v881_v23  ;;  %v893_v40 = vand.u32 2147483648, %v881_v23  ;;  %v891_v42 = vand.u32 2147483647, %v881_v23  ;;  %vm887_vm12 = vweird.f32 %v881_v23 }
 0x428   :  { %v860_v26 = vmul.f32 %v2340_v19, %v858_v11  ;;  %vm865_vm5 = vweird.f32 %v2340_v19  ;;  %v2773_v11 = vld [vmem:[#allocation5 + $0x1a8] sm:$0x3] }
 0x429   :  { %vm866_vm7 = vmor %vm864_vm6, %vm865_vm5  ;;  %v894_v46 = vor.u32 1.1754944e-38, %v893_v40  ;;  %vm892_vm15 = vcmp.eq.f32.partialorder %v891_v42, 8.507059e+37  ;;  %v2827_v8 = vperm.slane %v2773_v11, 1 }
 0x42a   :  { %v861_v32 = vsub.f32 1.0, %v860_v26 }
 0x42c   :  { %v862_v4 = vmul.f32 %v2340_v19, %v861_v32  ;;  %v2781_v32 = vld [vmem:[#allocation5 + $0x190] sm:$0xff] }
 0x42d   :  { %v2342_v35 = vpop.eup %2341  ;;  %1204 = vmatpush.msrb.mxu3 %v2781_v32 }
 0x42e   :  { %v883_v36 = vmul.f32 %v2342_v35, %v881_v23  ;;  %v863_v6 = vadd.f32 %v2340_v19, %v862_v4  ;;  %vm888_vm11 = vweird.f32 %v2342_v35  ;;  %v1070_v23 = vperm.slane %v2773_v11, 0 }
 0x42f   :  { %vm889_vm14 = vmor %vm887_vm12, %vm888_vm11  ;;  %1205 = vmatpush.msrb.mxu3 %v2783_v33 }
 0x430   :  { %v884_v37 = vsub.f32 1.0, %v883_v36  ;;  %v867_v38 = vsel %vm866_vm7, %v2340_v19, %v863_v6 }
 0x431   :  { %v872_v24 = vsel %vm869_vm10, %v871_v20, %v867_v38  ;;  %v2791_v20 = vld [vmem:[#allocation5 + $0x160] sm:$0xff] }
 0x432   :  { %v885_v39 = vmul.f32 %v2342_v35, %v884_v37  ;;  %v901_v41 = vmul.f32 %v899_v9, %v872_v24  ;;  %v2793_v37 = vld [vmem:[#allocation5 + $0x148] sm:$0xff]  ;;  %1206 = vmatpush.msrb.mxu3 %v2791_v20 }
 0x434   :  { %v886_v44 = vadd.f32 %v2342_v35, %v885_v39  ;;  %v902_v45 = vadd.f32 %v901_v41, %v850_v43  ;;  %1207 = vmatpush.msrb.mxu3 %v2793_v37 }
 0x436   :  { %v890_v47 = vsel %vm889_vm14, %v2342_v35, %v886_v44  ;;  %2343 = vtanh.f32 %v902_v45  ;;  %1406 = vmatpush.msra.mxu3 %v2719_v22 }
 0x437   :  { %v895_v48 = vsel %vm892_vm15, %v894_v46, %v890_v47 }
 0x438   :  { %v904_v49 = vsub.f32 1.0, %v895_v48  ;;  %v908_v55 = vmul.f32 %v906_v50, %v895_v48  ;;  %1407 = vmatpush.msra.mxu3 %v2721_v29  ;;  %v977_v50 = vld [vmem:[#allocation2 + $0x20] sm:$0x30] }
 0x43a   :  { %1408 = vmatpush.msra.mxu3 %v2724_v25 }
 0x43c   :  { %v2344_v51 = vpop.eup %2343  ;;  %1409 = vmatpush.msra.mxu3 %v2727_v31 }
 0x43d   :  { %v905_v52 = vmul.f32 %v2344_v51, %v904_v49 }
 0x43f   :  { %v2733_v56 = vadd.f32 %v908_v55, %v905_v52 }
 0x441   :  { %910 = vst.msk [vmem:[#allocation3 + $0x8] sm:$0xc] %vm410_vm3, %v2733_v56  ;;  %v912_v57 = vrot.slane %v2733_v56, 2 }
 0x443   :  { %2226 = vmatmul.msk.f32.vlgmr.msra.gmra.mxu0 %vm52_vm0, %v912_v57  ;;  %2227 = vmatmul.msk.f32.vlgmr.msra.gmra.mxu1 %vm52_vm0, %v912_v57 }
 0x444   :  { %2228 = vmatmul.msk.f32.vlgmr.msrb.gmra.mxu2 %vm52_vm0, %v912_v57  ;;  %1279 = vmatpush.msra.mxu0 %v2719_v22 }
 0x445   :  { %1184 = vmatpush.msrb.mxu2 %v2738_v58  ;;  %1299 = vmatpush.msra.mxu1 %v2738_v58 }
 0x446   :  { %1280 = vmatpush.msra.mxu0 %v2721_v29 }
 0x447   :  { %1185 = vmatpush.msrb.mxu2 %v2743_v59  ;;  %1300 = vmatpush.msra.mxu1 %v2743_v59 }
 0x448   :  { %1281 = vmatpush.msra.mxu0 %v2724_v25 }
 0x449   :  { %1186 = vmatpush.msrb.mxu2 %v2748_v53  ;;  %1301 = vmatpush.msra.mxu1 %v2748_v53 }
 0x44a   :  { %1282 = vmatpush.msra.mxu0 %v2727_v31 }
 0x44b   :  { %2233 = vmatmul.msk.f32.vlgmr.msrb.gmra.mxu0 %vm52_vm0, %v2710_v54  ;;  %2235 = vmatmul.msk.f32.vlgmr.msrb.gmra.mxu1 %vm52_vm0, %v2710_v54 }
 0x44c   :  { %1168 = vmatmul.f32.vlgmr.msra.gmra.mxu2 %v2495_v0  ;;  %1302 = vmatpush.msra.mxu1 %v2756_v61 }
 0x44d   :  { %1187 = vmatpush.msrb.mxu2 %v2756_v61  ;;  %1426 = vmatpush.msrb.mxu0 %v2738_v58 }
 0x44e   :  { %1446 = vmatpush.msrb.mxu1 %v2781_v32 }
 0x44f   :  { %1427 = vmatpush.msrb.mxu0 %v2743_v59  ;;  %1319 = vmatpush.msra.mxu2 %v2781_v32 }
 0x450   :  { %1447 = vmatpush.msrb.mxu1 %v2783_v33 }
 0x451   :  { %1428 = vmatpush.msrb.mxu0 %v2748_v53  ;;  %1320 = vmatpush.msra.mxu2 %v2783_v33 }
 0x452   :  { %1448 = vmatpush.msrb.mxu1 %v2791_v20 }
 0x453   :  { %1429 = vmatpush.msrb.mxu0 %v2756_v61  ;;  %1321 = vmatpush.msra.mxu2 %v2791_v20 }
 0x454   :  { %1188 = vmatmul.f32.vlgmr.msrb.gmra.mxu2 %v2495_v0  ;;  %1449 = vmatpush.msrb.mxu1 %v2793_v37 }
 0x455   :  { %1322 = vmatpush.msra.mxu2 %v2793_v37 }
 0x457   :  { %1533 = vmatpush.msrb.mxu2 %v2719_v22 }
 0x459   :  { %1534 = vmatpush.msrb.mxu2 %v2721_v29 }
 0x45b   :  { %1535 = vmatpush.msrb.mxu2 %v2724_v25 }
 0x45d   :  { %1536 = vmatpush.msrb.mxu2 %v2727_v31 }
 0x4c0   :  { %v932_v62 = vpop.f32.mrf.mxu0  ;;  %v952_v63 = vpop.f32.mrf.mxu1 }
 0x4c1   :  { %v979_v54 = vrot.slane %v932_v62, 4  ;;  %v1002_v2 = vrot.slane %v952_v63, 4  ;;  %v1033_v63 = vrot.slane %v2733_v56, 6 }
 0x4c3   :  { %v981_v13 = vadd.f32 %v979_v54, %v975_v1  ;;  %v1004_v14 = vadd.f32 %v1002_v2, %v976_v7 }
 0x4c5   :  { %v2229_v17 = vmul.f32 -1.442695, %v981_v13  ;;  %v2230_v18 = vmul.f32 -1.442695, %v1004_v14  ;;  %v1212_v14 = vld [vmem:[#allocation2 + $0x28] sm:$0x3] }
 0x4c7   :  { %2345 = vpow2.f32 %v2229_v17  ;;  %v972_v36 = vpop.f32.mrf.mxu2 }
 0x4c8   :  { %2347 = vpow2.f32 %v2230_v18  ;;  %v1117_v27 = vpop.f32.mrf.mxu0  ;;  %v1140_v28 = vpop.f32.mrf.mxu1  ;;  %v1024_v40 = vadd.f32 %v972_v36, %v2614_v60 }
 0x4c9   :  { %v1118_v30 = vadd.f32 %v1117_v27, %v1069_v21  ;;  %v1141_v15 = vadd.f32 %v1140_v28, %v1070_v23 }
 0x4ca   :  { %v1026_v60 = vrot.slane %v1024_v40, 4 }
 0x4cb   :  { %1147 = vst [vmem:[#allocation2 + $0x10] sm:$0xff] %v1118_v30 }
 0x4cc   :  { %1148 = vst [vmem:[#allocation2 + $0x8] sm:$0xff] %v1141_v15 }
 0x4cd   :  { %v2346_v19 = vpop.eup %2345 }
 0x4ce   :  { %v2348_v26 = vpop.eup %2347  ;;  %v985_v3 = vadd.f32 1.0, %v2346_v19 }
 0x4cf   :  { %v1008_v12 = vadd.f32 1.0, %v2348_v26  ;;  %v1169_v56 = vpop.f32.mrf.mxu2 }
 0x4d0   :  { %2349 = vrcp.f32 %v985_v3  ;;  %v997_v9 = vand.u32 2147483648, %v985_v3  ;;  %v995_v39 = vand.u32 2147483647, %v985_v3  ;;  %vm991_vm2 = vweird.f32 %v985_v3 }
 0x4d1   :  { %2351 = vrcp.f32 %v1008_v12  ;;  %v1020_v47 = vand.u32 2147483648, %v1008_v12  ;;  %vm1014_vm7 = vweird.f32 %v1008_v12  ;;  %v1018_v49 = vand.u32 2147483647, %v1008_v12 }
 0x4d2   :  { %v998_v43 = vor.u32 1.1754944e-38, %v997_v9  ;;  %vm996_vm5 = vcmp.eq.f32.partialorder %v995_v39, 8.507059e+37  ;;  %v1215_v17 = vadd.f32 %v1212_v14, %v1169_v56  ;;  %v1213_v28 = vld [vmem:[#allocation2 + $0x10] sm:$0x3]  ;;  %v1327_v14 = vld [vmem:[#allocation2 + $0x28] sm:$0xc] }
 0x4d3   :  { %v1021_v55 = vor.u32 1.1754944e-38, %v1020_v47  ;;  %vm1019_vm11 = vcmp.eq.f32.partialorder %v1018_v49, 8.507059e+37 }
 0x4d4   :  { %v2237_v18 = vmul.f32 -1.442695, %v1215_v17  ;;  %v1328_v17 = vld [vmem:[#allocation2 + $0x10] sm:$0xc] }
 0x4d6   :  { %v2350_v4 = vpop.eup %2349 }
 0x4d7   :  { %v2352_v16 = vpop.eup %2351  ;;  %v987_v34 = vmul.f32 %v2350_v4, %v985_v3  ;;  %vm992_vm1 = vweird.f32 %v2350_v4  ;;  %v1189_v27 = vpop.f32.mrf.mxu2 }
 0x4d8   :  { %v1010_v35 = vmul.f32 %v2352_v16, %v1008_v12  ;;  %vm993_vm4 = vmor %vm991_vm2, %vm992_vm1  ;;  %vm1015_vm6 = vweird.f32 %v2352_v16  ;;  %v1235_v30 = vadd.f32 %v1213_v28, %v1189_v27 }
 0x4d9   :  { %v988_v6 = vsub.f32 1.0, %v987_v34  ;;  %vm1016_vm10 = vmor %vm1014_vm7, %vm1015_vm6  ;;  %vm50_vm7 = vcmask 257024  }
 0x4da   :  { %v1011_v38 = vsub.f32 1.0, %v1010_v35  ;;  %v2238_v15 = vmul.f32 -1.442695, %v1235_v30 }
 0x4db   :  { %v989_v24 = vmul.f32 %v2350_v4, %v988_v6 }
 0x4dc   :  { %v1012_v41 = vmul.f32 %v2352_v16, %v1011_v38 }
 0x4dd   :  { %v990_v42 = vadd.f32 %v2350_v4, %v989_v24 }
 0x4de   :  { %v1013_v46 = vadd.f32 %v2352_v16, %v1012_v41 }
 0x4df   :  { %v994_v44 = vsel %vm993_vm4, %v2350_v4, %v990_v42 }
 0x4e0   :  { %v999_v45 = vsel %vm996_vm5, %v998_v43, %v994_v44  ;;  %v1017_v52 = vsel %vm1016_vm10, %v2352_v16, %v1013_v46 }
 0x4e1   :  { %v1028_v48 = vmul.f32 %v1026_v60, %v999_v45  ;;  %v1022_v57 = vsel %vm1019_vm11, %v1021_v55, %v1017_v52 }
 0x4e2   :  { %v1031_v62 = vsub.f32 1.0, %v1022_v57  ;;  %v1035_v2 = vmul.f32 %v1033_v63, %v1022_v57 }
 0x4e3   :  { %v1029_v51 = vadd.f32 %v1028_v48, %v977_v50  ;;  %v1214_v50 = vld [vmem:[#allocation2 + $0x8] sm:$0x3] }
 0x4e5   :  { %2353 = vtanh.f32 %v1029_v51 }
 0x4e6   :  { %2355 = vpow2.f32 %v2237_v18 }
 0x4e7   :  { %2357 = vpow2.f32 %v2238_v15 }
 0x4eb   :  { %v2354_v1 = vpop.eup %2353 }
 0x4ec   :  { %v1032_v54 = vmul.f32 %v2354_v1, %v1031_v62  ;;  %v2356_v19 = vpop.eup %2355 }
 0x4ed   :  { %v2358_v26 = vpop.eup %2357 }
 0x4ee   :  { %v1036_v7 = vadd.f32 %v1035_v2, %v1032_v54  ;;  %v1239_v3 = vadd.f32 1.0, %v2358_v26 }
 0x4f0   :  { %1037 = vst.msk [vmem:[#allocation3 + $0x8] sm:$0x30] %vm538_vm13, %v1036_v7  ;;  %v1251_v47 = vand.u32 2147483648, %v1239_v3  ;;  %vm1245_vm4 = vweird.f32 %v1239_v3  ;;  %v1249_v49 = vand.u32 2147483647, %v1239_v3 }
 0x4f2   :  { %v1252_v52 = vor.u32 1.1754944e-38, %v1251_v47  ;;  %vm1250_vm6 = vcmp.eq.f32.partialorder %v1249_v49, 8.507059e+37 }
 0x4f7   :  { %v1067_v13 = vld [vmem:[#allocation3 + $0x8] sm:$0xff] }
 0x4f8   :  { %2232 = vmatmul.msk.f32.gmra.mxu3 %vm52_vm0, %v1067_v13  ;;  %2234 = vmatmul.msk.f32.gmra.mxu0 %vm52_vm0, %v1067_v13 }
 0x4f9   :  { %2236 = vmatmul.msk.f32.gmra.mxu1 %vm52_vm0, %v1067_v13 }
 0x500   :  { %1208 = vmatmul.f32.vlgmr.msrb.gmra.mxu3 %v2495_v0  ;;  %v1219_v0 = vadd.f32 1.0, %v2356_v19 }
 0x501   :  { %1553 = vmatpush.msrb.mxu3 %v2738_v58 }
 0x502   :  { %2359 = vrcp.f32 %v1219_v0  ;;  %v1231_v43 = vand.u32 2147483648, %v1219_v0  ;;  %vm1225_vm14 = vweird.f32 %v1219_v0 }
 0x503   :  { %1554 = vmatpush.msrb.mxu3 %v2743_v59  ;;  %2361 = vrcp.f32 %v1239_v3 }
 0x504   :  { %v1232_v45 = vor.u32 1.1754944e-38, %v1231_v43 }
 0x505   :  { %1555 = vmatpush.msrb.mxu3 %v2748_v53 }
 0x507   :  { %1556 = vmatpush.msrb.mxu3 %v2756_v61 }
 0x508   :  { %v2360_v12 = vpop.eup %2359 }
 0x509   :  { %v1221_v4 = vmul.f32 %v2360_v12, %v1219_v0  ;;  %v2362_v34 = vpop.eup %2361  ;;  %vm1226_vm12 = vweird.f32 %v2360_v12 }
 0x50a   :  { %v1241_v9 = vmul.f32 %v2362_v34, %v1239_v3  ;;  %vm1227_vm15 = vmor %vm1225_vm14, %vm1226_vm12  ;;  %vm1246_vm2 = vweird.f32 %v2362_v34  ;;  %v49_v3 = vld [vmem:[%s2982_s1] sm:$0xf] }
 0x50b   :  { %v1222_v6 = vsub.f32 1.0, %v1221_v4  ;;  %vm1247_vm5 = vmor %vm1245_vm4, %vm1246_vm2  ;;  %51 = vst.msk [vmem:[#allocation4] sm:$0xf] %vm50_vm7, %v49_v3 }
 0x50c   :  { %v1242_v41 = vsub.f32 1.0, %v1241_v9 }
 0x50d   :  { %v1223_v24 = vmul.f32 %v2360_v12, %v1222_v6 }
 0x50e   :  { %v1243_v44 = vmul.f32 %v2362_v34, %v1242_v41 }
 0x50f   :  { %v1224_v42 = vadd.f32 %v2360_v12, %v1223_v24 }
 0x510   :  { %v1244_v5 = vadd.f32 %v2362_v34, %v1243_v44 }
 0x512   :  { %v1248_v51 = vsel %vm1247_vm5, %v2362_v34, %v1244_v5  ;;  %v1329_v5 = vld [vmem:[#allocation2 + $0x8] sm:$0xc] }
 0x513   :  { %v1253_v55 = vsel %vm1250_vm6, %v1252_v52, %v1248_v51 }
 0x514   :  { %v1259_v57 = vsub.f32 1.0, %v1253_v55  ;;  %v1261_v1 = vmul.f32 0.0, %v1253_v55 }
 0x575   :  { %v1120_v16 = vpop.f32.mrf.mxu0 }
 0x576   :  { %v1121_v35 = vadd.f32 %v1120_v16, %v1069_v21  ;;  %v1143_v36 = vpop.f32.mrf.mxu1  ;;  %v1229_v21 = vand.u32 2147483647, %v1219_v0 }
 0x577   :  { %v1144_v38 = vadd.f32 %v1143_v36, %v1070_v23  ;;  %v1228_v23 = vsel %vm1227_vm15, %v2360_v12, %v1224_v42 }
 0x578   :  { %1150 = vst [vmem:[#allocation2 + $0x18] sm:$0xff] %v1121_v35  ;;  %vm1230_vm1 = vcmp.eq.f32.partialorder %v1229_v21, 8.507059e+37 }
 0x579   :  { %1151 = vst [vmem:[#allocation2 + $0x20] sm:$0xff] %v1144_v38 }
 0x57b   :  { %v1097_v39 = vpop.f32.mrf.mxu3 }
 0x57c   :  { %v1098_v40 = vadd.f32 %v1097_v39, %v1068_v10  ;;  %v1233_v10 = vsel %vm1230_vm1, %v1232_v45, %v1228_v23 }
 0x57e   :  { %1149 = vst [vmem:[#allocation2] sm:$0xff] %v1098_v40 }
 0x583   :  { %v1209_v60 = vpop.f32.mrf.mxu3 }
 0x584   :  { %v1255_v46 = vadd.f32 %v1209_v60, %v2827_v8 }
 0x586   :  { %v1256_v48 = vmul.f32 %v1255_v46, %v1233_v10 }
 0x588   :  { %v1257_v11 = vadd.f32 %v1256_v48, %v1214_v50 }
 0x58a   :  { %2363 = vtanh.f32 %v1257_v11 }
 0x590   :  { %v2364_v62 = vpop.eup %2363 }
 0x591   :  { %v1260_v63 = vmul.f32 %v2364_v62, %v1259_v57 }
 0x593   :  { %v2830_v54 = vadd.f32 %v1261_v1, %v1260_v63 }
 0x595   :  { %1263 = vst.msk [vmem:[#allocation4 + $0x4] sm:$0x3] %vm283_vm9, %v2830_v54  ;;  %2239 = vmatmul.msk.f32.vlgmr.msra.gmra.mxu0 %vm52_vm0, %v2830_v54  ;;  %2240 = vmatmul.msk.f32.vlgmr.msra.gmra.mxu1 %vm52_vm0, %v2830_v54  ;;  %v1385_v11 = vrot.slane %v2830_v54, 6 }
 0x596   :  { %2241 = vmatmul.msk.f32.vlgmr.msra.gmra.mxu2 %vm52_vm0, %v2830_v54  ;;  %1573 = vmatpush.msra.mxu0 %v2781_v32  ;;  %v1455_v54 = vld [vmem:[#allocation2 + $0x10] sm:$0x30] }
 0x597   :  { %1660 = vmatpush.msra.mxu1 %v2719_v22  ;;  %1680 = vmatpush.msra.mxu2 %v2738_v58 }
 0x598   :  { %1574 = vmatpush.msra.mxu0 %v2783_v33 }
 0x599   :  { %1661 = vmatpush.msra.mxu1 %v2721_v29  ;;  %1681 = vmatpush.msra.mxu2 %v2743_v59 }
 0x59a   :  { %1575 = vmatpush.msra.mxu0 %v2791_v20 }
 0x59b   :  { %1662 = vmatpush.msra.mxu1 %v2724_v25  ;;  %1682 = vmatpush.msra.mxu2 %v2748_v53 }
 0x59c   :  { %1576 = vmatpush.msra.mxu0 %v2793_v37 }
 0x59d   :  { %1663 = vmatpush.msra.mxu1 %v2727_v31  ;;  %1683 = vmatpush.msra.mxu2 %v2756_v61 }
 0x612   :  { %v1284_v2 = vpop.f32.mrf.mxu0  ;;  %v1304_v7 = vpop.f32.mrf.mxu1 }
 0x613   :  { %v1331_v13 = vrot.slane %v1284_v2, 6  ;;  %v1354_v56 = vrot.slane %v1304_v7, 6 }
 0x615   :  { %v1333_v18 = vadd.f32 %v1331_v13, %v1327_v14  ;;  %v1356_v27 = vadd.f32 %v1354_v56, %v1328_v17  ;;  %v1454_v14 = vld [vmem:[#allocation2 + $0x28] sm:$0x30] }
 0x617   :  { %v2242_v28 = vmul.f32 -1.442695, %v1333_v18  ;;  %v2243_v30 = vmul.f32 -1.442695, %v1356_v27 }
 0x619   :  { %2365 = vpow2.f32 %v2242_v28  ;;  %v1324_v35 = vpop.f32.mrf.mxu2 }
 0x61a   :  { %2367 = vpow2.f32 %v2243_v30  ;;  %v1376_v39 = vadd.f32 %v1324_v35, %v2827_v8 }
 0x61c   :  { %v1378_v21 = vrot.slane %v1376_v39, 6 }
 0x61f   :  { %v2366_v15 = vpop.eup %2365 }
 0x620   :  { %v2368_v19 = vpop.eup %2367  ;;  %v1337_v0 = vadd.f32 1.0, %v2366_v15 }
 0x621   :  { %v1360_v26 = vadd.f32 1.0, %v2368_v19 }
 0x622   :  { %2369 = vrcp.f32 %v1337_v0  ;;  %v1349_v38 = vand.u32 2147483648, %v1337_v0  ;;  %v1347_v24 = vand.u32 2147483647, %v1337_v0  ;;  %vm1343_vm11 = vweird.f32 %v1337_v0 }
 0x623   :  { %2371 = vrcp.f32 %v1360_v26  ;;  %v1372_v60 = vand.u32 2147483648, %v1360_v26  ;;  %vm1366_vm1 = vweird.f32 %v1360_v26  ;;  %v1370_v46 = vand.u32 2147483647, %v1360_v26 }
 0x624   :  { %v1350_v42 = vor.u32 1.1754944e-38, %v1349_v38  ;;  %vm1348_vm14 = vcmp.eq.f32.partialorder %v1347_v24, 8.507059e+37 }
 0x625   :  { %v1373_v48 = vor.u32 1.1754944e-38, %v1372_v60  ;;  %vm1371_vm4 = vcmp.eq.f32.partialorder %v1370_v46, 8.507059e+37 }
 0x628   :  { %v2370_v12 = vpop.eup %2369 }
 0x629   :  { %v2372_v4 = vpop.eup %2371  ;;  %v1339_v16 = vmul.f32 %v2370_v12, %v1337_v0  ;;  %vm1344_vm10 = vweird.f32 %v2370_v12 }
 0x62a   :  { %v1362_v34 = vmul.f32 %v2372_v4, %v1360_v26  ;;  %vm1345_vm12 = vmor %vm1343_vm11, %vm1344_vm10  ;;  %vm1367_vm15 = vweird.f32 %v2372_v4 }
 0x62b   :  { %v1340_v36 = vsub.f32 1.0, %v1339_v16  ;;  %vm1368_vm2 = vmor %vm1366_vm1, %vm1367_vm15 }
 0x62c   :  { %v1363_v6 = vsub.f32 1.0, %v1362_v34 }
 0x62d   :  { %v1341_v9 = vmul.f32 %v2370_v12, %v1340_v36 }
 0x62e   :  { %v1364_v40 = vmul.f32 %v2372_v4, %v1363_v6 }
 0x62f   :  { %v1342_v41 = vadd.f32 %v2370_v12, %v1341_v9 }
 0x630   :  { %v1365_v23 = vadd.f32 %v2372_v4, %v1364_v40 }
 0x631   :  { %v1346_v43 = vsel %vm1345_vm12, %v2370_v12, %v1342_v41 }
 0x632   :  { %v1351_v44 = vsel %vm1348_vm14, %v1350_v42, %v1346_v43  ;;  %v1369_v47 = vsel %vm1368_vm2, %v2372_v4, %v1365_v23  ;;  %v1456_v23 = vld [vmem:[#allocation2 + $0x8] sm:$0x30] }
 0x633   :  { %v1380_v45 = vmul.f32 %v1378_v21, %v1351_v44  ;;  %v1374_v49 = vsel %vm1371_vm4, %v1373_v48, %v1369_v47 }
 0x634   :  { %v1383_v50 = vsub.f32 1.0, %v1374_v49  ;;  %v1387_v55 = vmul.f32 %v1385_v11, %v1374_v49 }
 0x635   :  { %v1381_v10 = vadd.f32 %v1380_v45, %v1329_v5 }
 0x637   :  { %2373 = vtanh.f32 %v1381_v10 }
 0x63d   :  { %v2374_v51 = vpop.eup %2373 }
 0x63e   :  { %v1384_v52 = vmul.f32 %v2374_v51, %v1383_v50 }
 0x640   :  { %v2857_v57 = vadd.f32 %v1387_v55, %v1384_v52 }
 0x642   :  { %1389 = vst.msk [vmem:[#allocation4 + $0x4] sm:$0xc] %vm410_vm3, %v2857_v57  ;;  %v1391_v62 = vrot.slane %v2857_v57, 2  ;;  %v1512_v10 = vrot.slane %v2857_v57, 6  ;;  %v1581_v57 = vld [vmem:[#allocation2 + $0x28] sm:$0xc0] }
 0x644   :  { %2244 = vmatmul.msk.f32.vlgmr.msra.gmra.mxu3 %vm52_vm0, %v1391_v62  ;;  %2245 = vmatmul.msk.f32.vlgmr.msrb.gmra.mxu0 %vm52_vm0, %v1391_v62 }
 0x645   :  { %2246 = vmatmul.msk.f32.vlgmr.msrb.gmra.mxu1 %vm52_vm0, %v1391_v62  ;;  %1700 = vmatpush.msra.mxu3 %v2781_v32 }
 0x646   :  { %1776 = vmatpush.msrb.mxu0 %v2719_v22  ;;  %1796 = vmatpush.msrb.mxu1 %v2738_v58 }
 0x647   :  { %1701 = vmatpush.msra.mxu3 %v2783_v33 }
 0x648   :  { %1777 = vmatpush.msrb.mxu0 %v2721_v29  ;;  %1797 = vmatpush.msrb.mxu1 %v2743_v59 }
 0x649   :  { %1702 = vmatpush.msra.mxu3 %v2791_v20 }
 0x64a   :  { %1778 = vmatpush.msrb.mxu0 %v2724_v25  ;;  %1798 = vmatpush.msrb.mxu1 %v2748_v53 }
 0x64b   :  { %1703 = vmatpush.msra.mxu3 %v2793_v37 }
 0x64c   :  { %1779 = vmatpush.msrb.mxu0 %v2727_v31  ;;  %1799 = vmatpush.msrb.mxu1 %v2756_v61 }
 0x6c1   :  { %v1431_v63 = vpop.f32.mrf.mxu0 }
 0x6c2   :  { %v1481_v1 = vrot.slane %v1431_v63, 4  ;;  %v1451_v4 = vpop.f32.mrf.mxu1 }
 0x6c3   :  { %v1503_v35 = vadd.f32 %v1451_v4, %v2827_v8 }
 0x6c4   :  { %v1483_v2 = vadd.f32 %v1481_v1, %v1455_v54 }
 0x6c5   :  { %v1505_v39 = vrot.slane %v1503_v35, 4 }
 0x6c6   :  { %v2248_v7 = vmul.f32 -1.442695, %v1483_v2 }
 0x6c7   :  { %v1411_v13 = vpop.f32.mrf.mxu3 }
 0x6c8   :  { %2375 = vpow2.f32 %v2248_v7  ;;  %v1458_v56 = vrot.slane %v1411_v13, 4 }
 0x6ca   :  { %v1460_v17 = vadd.f32 %v1458_v56, %v1454_v14 }
 0x6cc   :  { %v2247_v18 = vmul.f32 -1.442695, %v1460_v17 }
 0x6ce   :  { %v2376_v27 = vpop.eup %2375  ;;  %2377 = vpow2.f32 %v2247_v18 }
 0x6cf   :  { %v1487_v28 = vadd.f32 1.0, %v2376_v27 }
 0x6d1   :  { %2379 = vrcp.f32 %v1487_v28  ;;  %v1499_v43 = vand.u32 2147483648, %v1487_v28  ;;  %vm1493_vm12 = vweird.f32 %v1487_v28  ;;  %v1497_v44 = vand.u32 2147483647, %v1487_v28 }
 0x6d3   :  { %v1500_v46 = vor.u32 1.1754944e-38, %v1499_v43  ;;  %vm1498_vm15 = vcmp.eq.f32.partialorder %v1497_v44, 8.507059e+37 }
 0x6d4   :  { %v2378_v30 = vpop.eup %2377 }
 0x6d5   :  { %v1464_v15 = vadd.f32 1.0, %v2378_v30 }
 0x6d7   :  { %2381 = vrcp.f32 %v1464_v15  ;;  %v2380_v19 = vpop.eup %2379  ;;  %v1476_v34 = vand.u32 2147483648, %v1464_v15  ;;  %v1474_v6 = vand.u32 2147483647, %v1464_v15  ;;  %vm1470_vm6 = vweird.f32 %v1464_v15 }
 0x6d8   :  { %v1489_v0 = vmul.f32 %v2380_v19, %v1487_v28  ;;  %vm1494_vm11 = vweird.f32 %v2380_v19 }
 0x6d9   :  { %v1477_v24 = vor.u32 1.1754944e-38, %v1476_v34  ;;  %vm1475_vm10 = vcmp.eq.f32.partialorder %v1474_v6, 8.507059e+37  ;;  %vm1495_vm14 = vmor %vm1493_vm12, %vm1494_vm11 }
 0x6da   :  { %v1490_v12 = vsub.f32 1.0, %v1489_v0 }
 0x6dc   :  { %v1491_v38 = vmul.f32 %v2380_v19, %v1490_v12 }
 0x6dd   :  { %v2382_v26 = vpop.eup %2381 }
 0x6de   :  { %v1466_v3 = vmul.f32 %v2382_v26, %v1464_v15  ;;  %vm1471_vm5 = vweird.f32 %v2382_v26  ;;  %v1492_v41 = vadd.f32 %v2380_v19, %v1491_v38 }
 0x6df   :  { %vm1472_vm7 = vmor %vm1470_vm6, %vm1471_vm5 }
 0x6e0   :  { %v1467_v16 = vsub.f32 1.0, %v1466_v3  ;;  %v1496_v45 = vsel %vm1495_vm14, %v2380_v19, %v1492_v41 }
 0x6e1   :  { %v1501_v5 = vsel %vm1498_vm15, %v1500_v46, %v1496_v45 }
 0x6e2   :  { %v1468_v36 = vmul.f32 %v2382_v26, %v1467_v16  ;;  %v1510_v47 = vsub.f32 1.0, %v1501_v5  ;;  %v1514_v50 = vmul.f32 %v1512_v10, %v1501_v5  ;;  %v1709_v10 = vld [vmem:[#allocation2 + $0x18] sm:$0x3] }
 0x6e4   :  { %v1469_v9 = vadd.f32 %v2382_v26, %v1468_v36  ;;  %v1583_v36 = vld [vmem:[#allocation2 + $0x8] sm:$0xc0] }
 0x6e6   :  { %v1473_v40 = vsel %vm1472_vm7, %v2382_v26, %v1469_v9 }
 0x6e7   :  { %v1478_v42 = vsel %vm1475_vm10, %v1477_v24, %v1473_v40 }
 0x6e8   :  { %v1507_v21 = vmul.f32 %v1505_v39, %v1478_v42 }
 0x6ea   :  { %v1508_v60 = vadd.f32 %v1507_v21, %v1456_v23 }
 0x6ec   :  { %2383 = vtanh.f32 %v1508_v60  ;;  %v1708_v60 = vld [vmem:[#allocation2] sm:$0x3] }
 0x6f2   :  { %v2384_v48 = vpop.eup %2383 }
 0x6f3   :  { %v1511_v49 = vmul.f32 %v2384_v48, %v1510_v47 }
 0x6f5   :  { %v2879_v11 = vadd.f32 %v1514_v50, %v1511_v49 }
 0x6f7   :  { %1516 = vst.msk [vmem:[#allocation4 + $0x4] sm:$0x30] %vm538_vm13, %v2879_v11  ;;  %v1518_v51 = vrot.slane %v2879_v11, 4  ;;  %v1639_v40 = vrot.slane %v2879_v11, 6  ;;  %v2016_v11 = vld [vmem:[#allocation7 + $0x20] sm:$0xff] }
 0x6f9   :  { %2249 = vmatmul.msk.f32.vlgmr.msrb.gmra.mxu2 %vm52_vm0, %v1518_v51  ;;  %2250 = vmatmul.msk.f32.vlgmr.msrb.gmra.mxu3 %vm52_vm0, %v1518_v51 }
 0x6fa   :  { %2251 = vmatmul.msk.f32.vlgmr.msra.gmra.mxu0 %vm52_vm0, %v1518_v51  ;;  %1816 = vmatpush.msrb.mxu2 %v2781_v32 }
 0x6fb   :  { %1903 = vmatpush.msrb.mxu3 %v2719_v22  ;;  %1923 = vmatpush.msra.mxu0 %v2738_v58 }
 0x6fc   :  { %1817 = vmatpush.msrb.mxu2 %v2783_v33 }
 0x6fd   :  { %1904 = vmatpush.msrb.mxu3 %v2721_v29  ;;  %1924 = vmatpush.msra.mxu0 %v2743_v59  ;;  %v1582_v29 = vld [vmem:[#allocation2 + $0x10] sm:$0xc0] }
 0x6fe   :  { %1818 = vmatpush.msrb.mxu2 %v2791_v20 }
 0x6ff   :  { %1905 = vmatpush.msrb.mxu3 %v2724_v25  ;;  %1925 = vmatpush.msra.mxu0 %v2748_v53 }
 0x700   :  { %1819 = vmatpush.msrb.mxu2 %v2793_v37 }
 0x701   :  { %1906 = vmatpush.msrb.mxu3 %v2727_v31  ;;  %1926 = vmatpush.msra.mxu0 %v2756_v61 }
 0x777   :  { %v1578_v13 = vpop.f32.mrf.mxu0 }
 0x778   :  { %v1630_v27 = vadd.f32 %v1578_v13, %v2827_v8 }
 0x77a   :  { %v1632_v26 = vrot.slane %v1630_v27, 2 }
 0x77c   :  { %v1538_v22 = vpop.f32.mrf.mxu2  ;;  %v1558_v58 = vpop.f32.mrf.mxu3 }
 0x77d   :  { %v1585_v52 = vrot.slane %v1538_v22, 2  ;;  %v1608_v55 = vrot.slane %v1558_v58, 2 }
 0x77f   :  { %v1587_v62 = vadd.f32 %v1585_v52, %v1581_v57  ;;  %v1610_v59 = vadd.f32 %v1608_v55, %v1582_v29 }
 0x781   :  { %v2252_v63 = vmul.f32 -1.442695, %v1587_v62  ;;  %v2253_v1 = vmul.f32 -1.442695, %v1610_v59 }
 0x783   :  { %2385 = vpow2.f32 %v2252_v63 }
 0x784   :  { %2387 = vpow2.f32 %v2253_v1 }
 0x789   :  { %v2386_v25 = vpop.eup %2385 }
 0x78a   :  { %v2388_v53 = vpop.eup %2387  ;;  %v1591_v54 = vadd.f32 1.0, %v2386_v25 }
 0x78b   :  { %v1614_v2 = vadd.f32 1.0, %v2388_v53 }
 0x78c   :  { %2389 = vrcp.f32 %v1591_v54  ;;  %v1603_v17 = vand.u32 2147483648, %v1591_v54  ;;  %v1601_v30 = vand.u32 2147483647, %v1591_v54  ;;  %vm1597_vm2 = vweird.f32 %v1591_v54 }
 0x78d   :  { %2391 = vrcp.f32 %v1614_v2  ;;  %v1626_v34 = vand.u32 2147483648, %v1614_v2  ;;  %vm1620_vm7 = vweird.f32 %v1614_v2  ;;  %v1624_v35 = vand.u32 2147483647, %v1614_v2 }
 0x78e   :  { %v1604_v0 = vor.u32 1.1754944e-38, %v1603_v17  ;;  %vm1602_vm5 = vcmp.eq.f32.partialorder %v1601_v30, 8.507059e+37 }
 0x78f   :  { %v1627_v9 = vor.u32 1.1754944e-38, %v1626_v34  ;;  %vm1625_vm11 = vcmp.eq.f32.partialorder %v1624_v35, 8.507059e+37 }
 0x792   :  { %v2390_v31 = vpop.eup %2389 }
 0x793   :  { %v2392_v61 = vpop.eup %2391  ;;  %v1593_v7 = vmul.f32 %v2390_v31, %v1591_v54  ;;  %vm1598_vm1 = vweird.f32 %v2390_v31 }
 0x794   :  { %v1616_v56 = vmul.f32 %v2392_v61, %v1614_v2  ;;  %vm1599_vm4 = vmor %vm1597_vm2, %vm1598_vm1  ;;  %vm1621_vm6 = vweird.f32 %v2392_v61 }
 0x795   :  { %v1594_v14 = vsub.f32 1.0, %v1593_v7  ;;  %vm1622_vm10 = vmor %vm1620_vm7, %vm1621_vm6 }
 0x796   :  { %v1617_v18 = vsub.f32 1.0, %v1616_v56 }
 0x797   :  { %v1595_v28 = vmul.f32 %v2390_v31, %v1594_v14  ;;  %v1710_v14 = vld [vmem:[#allocation2 + $0x20] sm:$0x3] }
 0x798   :  { %v1618_v15 = vmul.f32 %v2392_v61, %v1617_v18 }
 0x799   :  { %v1596_v19 = vadd.f32 %v2390_v31, %v1595_v28 }
 0x79a   :  { %v1619_v4 = vadd.f32 %v2392_v61, %v1618_v15 }
 0x79b   :  { %v1600_v3 = vsel %vm1599_vm4, %v2390_v31, %v1596_v19 }
 0x79c   :  { %v1605_v12 = vsel %vm1602_vm5, %v1604_v0, %v1600_v3  ;;  %v1623_v38 = vsel %vm1622_vm10, %v2392_v61, %v1619_v4 }
 0x79d   :  { %v1634_v16 = vmul.f32 %v1632_v26, %v1605_v12  ;;  %v1628_v24 = vsel %vm1625_vm11, %v1627_v9, %v1623_v38  ;;  %v2029_v12 = vld [vmem:[#allocation4] sm:$0xff] }
 0x79e   :  { %v1637_v39 = vsub.f32 1.0, %v1628_v24  ;;  %v1641_v43 = vmul.f32 %v1639_v40, %v1628_v24 }
 0x79f   :  { %v1635_v6 = vadd.f32 %v1634_v16, %v1583_v36  ;;  %v1824_v36 = vld [vmem:[#allocation2] sm:$0xc] }
 0x7a1   :  { %2393 = vtanh.f32 %v1635_v6  ;;  %v1825_v6 = vld [vmem:[#allocation2 + $0x18] sm:$0xc] }
 0x7a7   :  { %v2394_v41 = vpop.eup %2393 }
 0x7a8   :  { %v1638_v42 = vmul.f32 %v2394_v41, %v1637_v39 }
 0x7aa   :  { %v1642_v21 = vadd.f32 %v1641_v43, %v1638_v42 }
 0x7ac   :  { %1643 = vst.msk [vmem:[#allocation4 + $0x4] sm:$0xc0] %vm666_vm8, %v1642_v21  ;;  %v2902_v44 = vrot.slane %v1642_v21, 6  ;;  %v2024_v21 = vld [vmem:[#allocation7 + $0x70] sm:$0xff] }
 0x7ae   :  { %2254 = vmatmul.msk.f32.vlgmr.msra.gmra.mxu1 %vm52_vm0, %v2902_v44  ;;  %2255 = vmatmul.msk.f32.vlgmr.msra.gmra.mxu2 %vm52_vm0, %v2902_v44 }
 0x7af   :  { %2256 = vmatmul.msk.f32.vlgmr.msra.gmra.mxu3 %vm52_vm0, %v2902_v44  ;;  %1943 = vmatpush.msra.mxu1 %v2781_v32  ;;  %v2017_v32 = vld [vmem:[#allocation7 + $0x30] sm:$0xff] }
 0x7b0   :  { %2053 = vmatpush.msra.mxu2 %v2017_v32  ;;  %2096 = vmatpush.msra.mxu3 %v2024_v21  ;;  %v2019_v32 = vld [vmem:[#allocation7 + $0x48] sm:$0xff] }
 0x7b1   :  { %1944 = vmatpush.msra.mxu1 %v2783_v33 }
 0x7b2   :  { %2054 = vmatpush.msra.mxu2 %v2016_v11 }
 0x7b3   :  { %1945 = vmatpush.msra.mxu1 %v2791_v20  ;;  %v2015_v20 = vld [vmem:[#allocation7 + $0x10] sm:$0xff] }
 0x7b4   :  { %2055 = vmatpush.msra.mxu2 %v2015_v20 }
 0x7b5   :  { %1946 = vmatpush.msra.mxu1 %v2793_v37  ;;  %v2014_v37 = vld [vmem:[#allocation7] sm:$0xff] }
 0x7b6   :  { %2056 = vmatpush.msra.mxu2 %v2014_v37 }
 0x82b   :  { %v1665_v23 = vpop.f32.mrf.mxu1 }
 0x82c   :  { %v1711_v45 = vadd.f32 %v1708_v60, %v1665_v23  ;;  %v2022_v23 = vld [vmem:[#allocation7 + $0x60] sm:$0xff]  ;;  %v2023_v60 = vld [vmem:[#allocation7 + $0x68] sm:$0xff] }
 0x82d   :  { %2097 = vmatpush.msra.mxu3 %v2022_v23 }
 0x82e   :  { %v2257_v46 = vmul.f32 -1.442695, %v1711_v45  ;;  %v2020_v45 = vld [vmem:[#allocation7 + $0x50] sm:$0xff] }
 0x82f   :  { %2098 = vmatpush.msra.mxu3 %v2020_v45 }
 0x830   :  { %2395 = vpow2.f32 %v2257_v46  ;;  %v2021_v46 = vld [vmem:[#allocation7 + $0x58] sm:$0xff] }
 0x831   :  { %v1685_v5 = vpop.f32.mrf.mxu2 }
 0x832   :  { %v1731_v47 = vadd.f32 %v1709_v10, %v1685_v5  ;;  %v1705_v59 = vpop.f32.mrf.mxu3 }
 0x833   :  { %v1751_v2 = vadd.f32 %v1705_v59, %v2827_v8 }
 0x834   :  { %v2258_v48 = vmul.f32 -1.442695, %v1731_v47 }
 0x836   :  { %v2396_v49 = vpop.eup %2395  ;;  %2397 = vpow2.f32 %v2258_v48 }
 0x837   :  { %v1715_v50 = vadd.f32 1.0, %v2396_v49 }
 0x839   :  { %2399 = vrcp.f32 %v1715_v50  ;;  %v1727_v55 = vand.u32 2147483648, %v1715_v50  ;;  %v1725_v29 = vand.u32 2147483647, %v1715_v50  ;;  %vm1721_vm12 = vweird.f32 %v1715_v50 }
 0x83b   :  { %v1728_v25 = vor.u32 1.1754944e-38, %v1727_v55  ;;  %vm1726_vm15 = vcmp.eq.f32.partialorder %v1725_v29, 8.507059e+37 }
 0x83c   :  { %v2398_v33 = vpop.eup %2397 }
 0x83d   :  { %v1735_v51 = vadd.f32 1.0, %v2398_v33 }
 0x83f   :  { %v2400_v22 = vpop.eup %2399  ;;  %2401 = vrcp.f32 %v1735_v51  ;;  %v1747_v7 = vand.u32 2147483648, %v1735_v51  ;;  %v1745_v56 = vand.u32 2147483647, %v1735_v51  ;;  %vm1741_vm2 = vweird.f32 %v1735_v51 }
 0x840   :  { %v1717_v58 = vmul.f32 %v2400_v22, %v1715_v50  ;;  %vm1722_vm8 = vweird.f32 %v2400_v22  ;;  %v2018_v50 = vld [vmem:[#allocation7 + $0x40] sm:$0xff] }
 0x841   :  { %vm1723_vm14 = vmor %vm1721_vm12, %vm1722_vm8  ;;  %v1748_v27 = vor.u32 1.1754944e-38, %v1747_v7  ;;  %vm1746_vm5 = vcmp.eq.f32.partialorder %v1745_v56, 8.507059e+37  ;;  %2099 = vmatpush.msra.mxu3 %v2018_v50 }
 0x842   :  { %v1718_v52 = vsub.f32 1.0, %v1717_v58 }
 0x844   :  { %v1719_v57 = vmul.f32 %v2400_v22, %v1718_v52 }
 0x845   :  { %v2402_v62 = vpop.eup %2401 }
 0x846   :  { %v1737_v63 = vmul.f32 %v2402_v62, %v1735_v51  ;;  %v1720_v1 = vadd.f32 %v2400_v22, %v1719_v57  ;;  %vm1742_vm1 = vweird.f32 %v2402_v62 }
 0x847   :  { %vm1743_vm4 = vmor %vm1741_vm2, %vm1742_vm1 }
 0x848   :  { %v1738_v53 = vsub.f32 1.0, %v1737_v63  ;;  %v1724_v54 = vsel %vm1723_vm14, %v2400_v22, %v1720_v1 }
 0x849   :  { %v1729_v31 = vsel %vm1726_vm15, %v1728_v25, %v1724_v54 }
 0x84a   :  { %v1739_v61 = vmul.f32 %v2402_v62, %v1738_v53  ;;  %v1752_v13 = vmul.f32 %v1751_v2, %v1729_v31  ;;  %v1826_v53 = vld [vmem:[#allocation2 + $0x20] sm:$0xc] }
 0x84c   :  { %v1740_v17 = vadd.f32 %v2402_v62, %v1739_v61  ;;  %v1753_v18 = vadd.f32 %v1752_v13, %v1710_v14 }
 0x84e   :  { %v1744_v28 = vsel %vm1743_vm4, %v2402_v62, %v1740_v17  ;;  %2403 = vtanh.f32 %v1753_v18 }
 0x84f   :  { %v1749_v30 = vsel %vm1746_vm5, %v1748_v27, %v1744_v28  ;;  %v2934_v28 = vld [vmem:[#allocation7 + $0x80] ss:$0 sm:$0xff] }
 0x850   :  { %v1755_v15 = vsub.f32 1.0, %v1749_v30  ;;  %v1758_v26 = vmul.f32 %v1749_v30, %v2902_v44  ;;  %v2025_v44 = vld [vmem:[#allocation7 + $0x78] sm:$0xff] }
 0x854   :  { %v2404_v19 = vpop.eup %2403 }
 0x855   :  { %v1756_v0 = vmul.f32 %v2404_v19, %v1755_v15 }
 0x857   :  { %v2916_v3 = vadd.f32 %v1758_v26, %v1756_v0 }
 0x859   :  { %1760 = vst.msk [vmem:[#allocation4 + $0xc] sm:$0x3] %vm283_vm9, %v2916_v3  ;;  %2259 = vmatmul.msk.f32.vlgmr.msrb.gmra.mxu0 %vm52_vm0, %v2916_v3  ;;  %2260 = vmatmul.msk.f32.vlgmr.msrb.gmra.mxu1 %vm52_vm0, %v2916_v3  ;;  %v1882_v13 = vrot.slane %v2916_v3, 6 }
 0x85a   :  { %2261 = vmatmul.msk.f32.vlgmr.msrb.gmra.mxu2 %vm52_vm0, %v2916_v3  ;;  %2122 = vmatpush.msrb.mxu0 %v2025_v44 }
 0x85c   :  { %2123 = vmatpush.msrb.mxu0 %v2023_v60 }
 0x85e   :  { %2124 = vmatpush.msrb.mxu0 %v2021_v46 }
 0x860   :  { %2125 = vmatpush.msrb.mxu0 %v2019_v32 }
 0x862   :  { %2269 = vmatmul.msk.f32.vlgmr.msra.gmra.mxu2 %vm52_vm0, %v2029_v12  ;;  %v1952_v12 = vld [vmem:[#allocation2 + $0x18] sm:$0x30] }
 0x8d6   :  { %v1781_v4 = vpop.f32.mrf.mxu0  ;;  %v1801_v16 = vpop.f32.mrf.mxu1 }
 0x8d7   :  { %v1828_v34 = vrot.slane %v1781_v4, 6  ;;  %v1851_v35 = vrot.slane %v1801_v16, 6  ;;  %v2028_v4 = vld [vmem:[#allocation7 + $0x81] ss:$8 sm:$0x3] }
 0x8d9   :  { %v1830_v38 = vadd.f32 %v1828_v34, %v1824_v36  ;;  %v1853_v9 = vadd.f32 %v1851_v35, %v1825_v6  ;;  %v2943_v35 = vperm.slane %v2028_v4, 1 }
 0x8db   :  { %v2262_v24 = vmul.f32 -1.442695, %v1830_v38  ;;  %v2263_v39 = vmul.f32 -1.442695, %v1853_v9  ;;  %v1951_v38 = vld [vmem:[#allocation2] sm:$0x30] }
 0x8dd   :  { %2405 = vpow2.f32 %v2262_v24  ;;  %v1821_v49 = vpop.f32.mrf.mxu2 }
 0x8de   :  { %2407 = vpow2.f32 %v2263_v39  ;;  %v1873_v22 = vadd.f32 %v1821_v49, %v2827_v8 }
 0x8e0   :  { %v1875_v29 = vrot.slane %v1873_v22, 6 }
 0x8e3   :  { %v2406_v40 = vpop.eup %2405 }
 0x8e4   :  { %v2408_v41 = vpop.eup %2407  ;;  %v1834_v42 = vadd.f32 1.0, %v2406_v40 }
 0x8e5   :  { %v1857_v43 = vadd.f32 1.0, %v2408_v41  ;;  %v2058_v30 = vpop.f32.mrf.mxu2 }
 0x8e6   :  { %2409 = vrcp.f32 %v1834_v42  ;;  %v1846_v20 = vand.u32 2147483648, %v1834_v42  ;;  %v1844_v37 = vand.u32 2147483647, %v1834_v42  ;;  %vm1840_vm6 = vweird.f32 %v1834_v42 }
 0x8e7   :  { %2411 = vrcp.f32 %v1857_v43  ;;  %v1869_v63 = vand.u32 2147483648, %v1857_v43  ;;  %vm1863_vm8 = vweird.f32 %v1857_v43  ;;  %v1867_v25 = vand.u32 2147483647, %v1857_v43 }
 0x8e8   :  { %v1847_v55 = vor.u32 1.1754944e-38, %v1846_v20  ;;  %vm1845_vm10 = vcmp.eq.f32.partialorder %v1844_v37, 8.507059e+37  ;;  %v2059_v15 = vadd.f32 %v2058_v30, %v2934_v28 }
 0x8e9   :  { %v1870_v31 = vor.u32 1.1754944e-38, %v1869_v63  ;;  %vm1868_vm14 = vcmp.eq.f32.partialorder %v1867_v25, 8.507059e+37 }
 0x8ea   :  { %v2067_v0 = vmax.f32 %v2059_v15, 0.0  ;;  %v1953_v15 = vld [vmem:[#allocation2 + $0x20] sm:$0x30] }
 0x8ec   :  { %v2410_v5 = vpop.eup %2409 }
 0x8ed   :  { %v2412_v10 = vpop.eup %2411  ;;  %v1836_v47 = vmul.f32 %v2410_v5, %v1834_v42  ;;  %vm1841_vm9 = vweird.f32 %v2410_v5  ;;  %v2946_v42 = vperm.slane %v2028_v4, 0 }
 0x8ee   :  { %v1859_v48 = vmul.f32 %v2412_v10, %v1857_v43  ;;  %vm1842_vm7 = vmor %vm1840_vm6, %vm1841_vm9  ;;  %vm1864_vm11 = vweird.f32 %v2412_v10 }
 0x8ef   :  { %v1837_v11 = vsub.f32 1.0, %v1836_v47  ;;  %vm1865_vm12 = vmor %vm1863_vm8, %vm1864_vm11 }
 0x8f0   :  { %v1860_v33 = vsub.f32 1.0, %v1859_v48 }
 0x8f1   :  { %v1838_v51 = vmul.f32 %v2410_v5, %v1837_v11 }
 0x8f2   :  { %v1861_v58 = vmul.f32 %v2412_v10, %v1860_v33 }
 0x8f3   :  { %v1839_v52 = vadd.f32 %v2410_v5, %v1838_v51 }
 0x8f4   :  { %v1862_v59 = vadd.f32 %v2412_v10, %v1861_v58 }
 0x8f5   :  { %v1843_v57 = vsel %vm1842_vm7, %v2410_v5, %v1839_v52 }
 0x8f6   :  { %v1848_v62 = vsel %vm1845_vm10, %v1847_v55, %v1843_v57  ;;  %v1866_v2 = vsel %vm1865_vm12, %v2412_v10, %v1862_v59 }
 0x8f7   :  { %v1877_v1 = vmul.f32 %v1875_v29, %v1848_v62  ;;  %v1871_v61 = vsel %vm1868_vm14, %v1870_v31, %v1866_v2 }
 0x8f8   :  { %v1880_v7 = vsub.f32 1.0, %v1871_v61  ;;  %v1884_v17 = vmul.f32 %v1882_v13, %v1871_v61 }
 0x8f9   :  { %v1878_v54 = vadd.f32 %v1877_v1, %v1826_v53 }
 0x8fb   :  { %2413 = vtanh.f32 %v1878_v54 }
 0x901   :  { %v2414_v56 = vpop.eup %2413 }
 0x902   :  { %v1881_v14 = vmul.f32 %v2414_v56, %v1880_v7 }
 0x904   :  { %v2929_v18 = vadd.f32 %v1884_v17, %v1881_v14 }
 0x906   :  { %1886 = vst.msk [vmem:[#allocation4 + $0xc] sm:$0xc] %vm410_vm3, %v2929_v18  ;;  %v1888_v27 = vrot.slane %v2929_v18, 2 }
 0x908   :  { %2264 = vmatmul.msk.f32.vlgmr.msrb.gmra.mxu3 %vm52_vm0, %v1888_v27  ;;  %2265 = vmatmul.msk.f32.vlgmr.msra.gmra.mxu0 %vm52_vm0, %v1888_v27 }
 0x909   :  { %2266 = vmatmul.msk.f32.vlgmr.msra.gmra.mxu1 %vm52_vm0, %v1888_v27 }
 0x90d   :  { %v2030_v19 = vld [vmem:[#allocation4 + $0x8] sm:$0xff] }
 0x90e   :  { %2270 = vmatmul.msk.f32.gmra.mxu2 %vm52_vm0, %v2030_v19 }
 0x910   :  { %2272 = vmatmul.msk.f32.vlgmr.msra.gmra.mxu3 %vm52_vm0, %v2067_v0  ;;  %2275 = vmatmul.msk.f32.vlgmr.msrb.gmra.mxu0 %vm52_vm0, %v2067_v0 }
 0x985   :  { %v1928_v26 = vpop.f32.mrf.mxu0 }
 0x986   :  { %v1978_v3 = vrot.slane %v1928_v26, 4  ;;  %v1948_v51 = vpop.f32.mrf.mxu1 }
 0x987   :  { %v2000_v29 = vadd.f32 %v1948_v51, %v2827_v8 }
 0x988   :  { %v1980_v16 = vadd.f32 %v1978_v3, %v1952_v12  ;;  %v2009_v12 = vrot.slane %v2929_v18, 6 }
 0x989   :  { %v2002_v13 = vrot.slane %v2000_v29, 4 }
 0x98a   :  { %v2268_v34 = vmul.f32 -1.442695, %v1980_v16 }
 0x98b   :  { %v1908_v36 = vpop.f32.mrf.mxu3 }
 0x98c   :  { %2415 = vpow2.f32 %v2268_v34  ;;  %v1955_v6 = vrot.slane %v1908_v36, 4 }
 0x98d   :  { %v2127_v9 = vpop.f32.mrf.mxu0 }
 0x98e   :  { %v1957_v24 = vadd.f32 %v1955_v6, %v1951_v38  ;;  %v2128_v39 = vadd.f32 %v2127_v9, %v2943_v35 }
 0x990   :  { %v2267_v40 = vmul.f32 -1.442695, %v1957_v24  ;;  %v2142_v41 = vand.u32 2147483647, %v2128_v39  ;;  %v2139_v54 = vmax.f32 %v2128_v39, 0.0 }
 0x991   :  { %v2061_v43 = vpop.f32.mrf.mxu2 }
 0x992   :  { %v2416_v21 = vpop.eup %2415  ;;  %2417 = vpow2.f32 %v2267_v40  ;;  %v2145_v44 = vsub.f32 0.0, %v2142_v41  ;;  %v2062_v23 = vadd.f32 %v2061_v43, %v2934_v28 }
 0x993   :  { %v1984_v60 = vadd.f32 1.0, %v2416_v21  ;;  %v2101_v45 = vpop.f32.mrf.mxu3 }
 0x994   :  { %v2148_v46 = vmul.f32 1.442695, %v2145_v44  ;;  %v2068_v5 = vmax.f32 %v2062_v23, 0.0  ;;  %v2102_v10 = vadd.f32 %v2101_v45, %v2946_v42 }
 0x995   :  { %2419 = vrcp.f32 %v1984_v60  ;;  %v1996_v17 = vand.u32 2147483648, %v1984_v60  ;;  %vm1990_vm9 = vweird.f32 %v1984_v60  ;;  %v1994_v30 = vand.u32 2147483647, %v1984_v60 }
 0x996   :  { %2421 = vpow2.f32 %v2148_v46  ;;  %2136 = vst [vmem:[%s2985_s4] sm:$0xff] %v2102_v10  ;;  %2273 = vmatmul.msk.f32.gmra.mxu3 %vm52_vm0, %v2068_v5  ;;  %2276 = vmatmul.msk.f32.gmra.mxu0 %vm52_vm0, %v2068_v5 }
 0x997   :  { %v1997_v26 = vor.u32 1.1754944e-38, %v1996_v17  ;;  %vm1995_vm7 = vcmp.eq.f32.partialorder %v1994_v30, 8.507059e+37 }
 0x998   :  { %v2418_v47 = vpop.eup %2417 }
 0x999   :  { %v1961_v48 = vadd.f32 1.0, %v2418_v47 }
 0x99b   :  { %v2420_v49 = vpop.eup %2419  ;;  %2423 = vrcp.f32 %v1961_v48  ;;  %v1971_v62 = vand.u32 2147483647, %v1961_v48  ;;  %v1973_v59 = vand.u32 2147483648, %v1961_v48  ;;  %vm1967_vm1 = vweird.f32 %v1961_v48 }
 0x99c   :  { %v2422_v50 = vpop.eup %2421  ;;  %v1986_v33 = vmul.f32 %v2420_v49, %v1984_v60  ;;  %vm1991_vm5 = vweird.f32 %v2420_v49 }
 0x99d   :  { %v2154_v32 = vadd.f32 1.0, %v2422_v50  ;;  %v2157_v11 = vmul.f32 -0.5, %v2422_v50  ;;  %v2160_v52 = vand.u32 2147483647, %v2422_v50  ;;  %v1974_v61 = vor.u32 1.1754944e-38, %v1973_v59  ;;  %vm1992_vm6 = vmor %vm1990_vm9, %vm1991_vm5 }
 0x99e   :  { %v1987_v58 = vsub.f32 1.0, %v1986_v33  ;;  %vm1972_vm4 = vcmp.eq.f32.partialorder %v1971_v62, 8.507059e+37 }
 0x99f   :  { %2425 = vlog2.f32 %v2154_v32  ;;  %v2158_v22 = vadd.f32 1.0, %v2157_v11  ;;  %vm2161_vm15 = vcmp.lt.f32.partialorder %v2160_v52, 0.0004427343 }
 0x9a0   :  { %v1988_v53 = vmul.f32 %v2420_v49, %v1987_v58 }
 0x9a1   :  { %v2424_v20 = vpop.eup %2423  ;;  %v2159_v25 = vmul.f32 %v2422_v50, %v2158_v22 }
 0x9a2   :  { %v1963_v37 = vmul.f32 %v2424_v20, %v1961_v48  ;;  %vm1968_vm3 = vweird.f32 %v2424_v20  ;;  %v1989_v14 = vadd.f32 %v2420_v49, %v1988_v53 }
 0x9a3   :  { %vm1969_vm2 = vmor %vm1967_vm1, %vm1968_vm3 }
 0x9a4   :  { %v1964_v55 = vsub.f32 1.0, %v1963_v37  ;;  %v1993_v0 = vsel %vm1992_vm6, %v2420_v49, %v1989_v14 }
 0x9a5   :  { %v2426_v57 = vpop.eup %2425  ;;  %v1998_v3 = vsel %vm1995_vm7, %v1997_v26, %v1993_v0 }
 0x9a6   :  { %v1965_v63 = vmul.f32 %v2424_v20, %v1964_v55  ;;  %v2156_v1 = vmul.f32 0.6931472, %v2426_v57  ;;  %v2007_v4 = vsub.f32 1.0, %v1998_v3  ;;  %v2011_v34 = vmul.f32 %v2009_v12, %v1998_v3 }
 0x9a8   :  { %v1966_v2 = vadd.f32 %v2424_v20, %v1965_v63  ;;  %v2162_v31 = vsel %vm2161_vm15, %v2159_v25, %v2156_v1 }
 0x9a9   :  { %v2181_v7 = vadd.f32 %v2162_v31, %v2139_v54 }
 0x9aa   :  { %v1970_v56 = vsel %vm1969_vm2, %v2424_v20, %v1966_v2 }
 0x9ab   :  { %v1975_v8 = vsel %vm1972_vm4, %v1974_v61, %v1970_v56  ;;  %2184 = vst [vmem:[%s2985_s4 + $0x8] sm:$0xff] %v2181_v7 }
 0x9ac   :  { %v2004_v27 = vmul.f32 %v2002_v13, %v1975_v8 }
 0x9ae   :  { %v2005_v19 = vadd.f32 %v2004_v27, %v1953_v15 }
 0x9b0   :  { %2427 = vtanh.f32 %v2005_v19 }
 0x9b6   :  { %v2428_v16 = vpop.eup %2427 }
 0x9b7   :  { %v2008_v36 = vmul.f32 %v2428_v16, %v2007_v4 }
 0x9b9   :  { %v2012_v6 = vadd.f32 %v2011_v34, %v2008_v36 }
 0x9bb   :  { %2013 = vst.msk [vmem:[#allocation4 + $0xc] sm:$0x30] %vm538_vm13, %v2012_v6 }
 0x9c2   :  { %v2031_v38 = vld [vmem:[#allocation4 + $0x10] sm:$0x3] }
 0x9c3   :  { %2271 = vmatmul.msk.f32.gmra.mxu2 %vm52_vm0, %v2031_v38 }
 0xa13   :  { %v2130_v9 = vpop.f32.mrf.mxu0 }
 0xa14   :  { %v2131_v24 = vadd.f32 %v2130_v9, %v2943_v35 }
 0xa16   :  { %v2143_v39 = vand.u32 2147483647, %v2131_v24  ;;  %v2140_v47 = vmax.f32 %v2131_v24, 0.0 }
 0xa18   :  { %v2146_v40 = vsub.f32 0.0, %v2143_v39 }
 0xa19   :  { %v2104_v41 = vpop.f32.mrf.mxu3 }
 0xa1a   :  { %v2150_v43 = vmul.f32 1.442695, %v2146_v40  ;;  %v2105_v21 = vadd.f32 %v2104_v41, %v2946_v42 }
 0xa1c   :  { %2429 = vpow2.f32 %v2150_v43  ;;  %2137 = vst [vmem:[%s2985_s4 + $0x10] sm:$0xff] %v2105_v21 }
 0xa22   :  { %v2430_v18 = vpop.eup %2429 }
 0xa23   :  { %v2163_v44 = vadd.f32 1.0, %v2430_v18  ;;  %v2166_v23 = vmul.f32 -0.5, %v2430_v18  ;;  %v2169_v45 = vand.u32 2147483647, %v2430_v18 }
 0xa25   :  { %2431 = vlog2.f32 %v2163_v44  ;;  %v2167_v60 = vadd.f32 1.0, %v2166_v23  ;;  %vm2170_vm13 = vcmp.lt.f32.partialorder %v2169_v45, 0.0004427343 }
 0xa27   :  { %v2168_v10 = vmul.f32 %v2430_v18, %v2167_v60 }
 0xa2b   :  { %v2432_v46 = vpop.eup %2431 }
 0xa2c   :  { %v2165_v5 = vmul.f32 0.6931472, %v2432_v46 }
 0xa2e   :  { %v2171_v48 = vsel %vm2170_vm13, %v2168_v10, %v2165_v5 }
 0xa2f   :  { %v2182_v49 = vadd.f32 %v2171_v48, %v2140_v47 }
 0xa31   :  { %2185 = vst [vmem:[%s2985_s4 + $0x18] sm:$0xff] %v2182_v49 }
 0xa46   :  { %v2064_v50 = vpop.f32.mrf.mxu2 }
 0xa47   :  { %v2065_v32 = vadd.f32 %v2064_v50, %v2934_v28 }
 0xa49   :  { %v2069_v11 = vmax.f32 %v2065_v32, 0.0 }
 0xa4b   :  { %2274 = vmatmul.msk.f32.gmra.mxu3 %vm52_vm0, %v2069_v11  ;;  %2277 = vmatmul.msk.f32.gmra.mxu0 %vm52_vm0, %v2069_v11 }
 0xac8   :  { %v2133_v33 = vpop.f32.mrf.mxu0 }
 0xac9   :  { %v2134_v20 = vadd.f32 %v2133_v33, %v2943_v35 }
 0xacb   :  { %v2144_v51 = vand.u32 2147483647, %v2134_v20  ;;  %v2141_v1 = vmax.f32 %v2134_v20, 0.0 }
 0xacd   :  { %v2147_v37 = vsub.f32 0.0, %v2144_v51 }
 0xace   :  { %v2107_v22 = vpop.f32.mrf.mxu3 }
 0xacf   :  { %v2152_v58 = vmul.f32 1.442695, %v2147_v37  ;;  %v2108_v52 = vadd.f32 %v2107_v22, %v2946_v42 }
 0xad1   :  { %2433 = vpow2.f32 %v2152_v58  ;;  %2138 = vst [vmem:[%s2985_s4 + $0x20] sm:$0x3] %v2108_v52 }
 0xad7   :  { %v2434_v28 = vpop.eup %2433 }
 0xad8   :  { %v2172_v55 = vadd.f32 1.0, %v2434_v28  ;;  %v2175_v57 = vmul.f32 -0.5, %v2434_v28  ;;  %v2178_v62 = vand.u32 2147483647, %v2434_v28 }
 0xada   :  { %2435 = vlog2.f32 %v2172_v55  ;;  %v2176_v29 = vadd.f32 1.0, %v2175_v57  ;;  %vm2179_vm0 = vcmp.lt.f32.partialorder %v2178_v62, 0.0004427343 }
 0xadc   :  { %v2177_v35 = vmul.f32 %v2434_v28, %v2176_v29 }
 0xae0   :  { %v2436_v59 = vpop.eup %2435 }
 0xae1   :  { %v2174_v63 = vmul.f32 0.6931472, %v2436_v59 }
 0xae3   :  { %v2180_v25 = vsel %vm2179_vm0, %v2177_v35, %v2174_v63 }
 0xae4   :  { %v2183_v53 = vadd.f32 %v2180_v25, %v2141_v1 }
 0xae6   :  { %2186 = vst [vmem:[%s2985_s4 + $0x28] sm:$0x3] %v2183_v53 }
 0xae7   :  { %2191 = vsyncpa [#allocation6], 1 }
 0xae8   :  { %2192 = vsyncpa [#allocation8], 1 }

</bundles_post_ra>
